<compile_context>
chip_gen: v5e
topology: v5e:2x2
jax: 0.10.0
libtpu: 0.0.40
codegen_flags: <defaults>
</compile_context>

<pallas_src>
import functools
import math

import jax
import jax.numpy as jnp
from jax import lax
from jax.experimental import pallas as pl
from jax.experimental.pallas import tpu as pltpu


# ---------------------------------------------------------------------------
# Kernel (one grid step == one transformer layer)
# ---------------------------------------------------------------------------
def _layer_norm(x, gamma, beta, eps=1e-5):
    mu = jnp.mean(x, axis=-1, keepdims=True)
    var = jnp.mean((x - mu) ** 2, axis=-1, keepdims=True)
    return (x - mu) * lax.rsqrt(var + eps) * gamma + beta


def _transformer_layer_kernel(x_ref,
                              ln1g_ref, ln1b_ref,
                              wqkv_ref, wo_ref, bo_ref,
                              ln2g_ref, ln2b_ref,
                              w1_ref, b1_ref, w2_ref, b2_ref,
                              o_ref,
                              act_ref,
                              *, heads, dim_head, batch, seq):
    l = pl.program_id(0)

    # Load the input activation once; afterwards it is carried layer-to-layer in VMEM.
    @pl.when(l == 0)
    def _():
        act_ref[...] = x_ref[...].astype(jnp.float32)

    x = act_ref[...]                                  # (B*N, D) f32 carried activation
    rows, dim = x.shape
    inner = heads * dim_head

    # ---------------- attention: PreNorm -> fused QKV -> per-head softmax -> out-proj ----
    xn = _layer_norm(x, ln1g_ref[0], ln1b_ref[0])

    wqkv = wqkv_ref[0]                                # (dim, 3*inner), scale baked into Q cols
    qkv = jnp.dot(xn.astype(wqkv.dtype), wqkv,
                  preferred_element_type=jnp.float32)  # (B*N, 3*inner) — single MXU pass
    qkv = qkv.reshape(batch, seq, 3 * inner)           # leading-dim split only (layout-safe)

    head_outs = []
    for h in range(heads):                            # static; only the tiny score einsums
        q = qkv[:, :, h * dim_head:(h + 1) * dim_head]                         # (B,N,dh)
        k = qkv[:, :, inner + h * dim_head:inner + (h + 1) * dim_head]
        v = qkv[:, :, 2 * inner + h * dim_head:2 * inner + (h + 1) * dim_head]

        dots = jnp.einsum('bnd,bmd->bnm', q, k,
                          preferred_element_type=jnp.float32)                  # (B,N,N)
        dots = dots - jnp.max(dots, axis=-1, keepdims=True)
        e = jnp.exp(dots)
        denom = jnp.sum(e, axis=-1, keepdims=True)
        attn = e * pl.reciprocal(denom)               # exact reciprocal (parity w/ softmax)
        head_outs.append(jnp.einsum('bnm,bmd->bnd', attn, v,
                                    preferred_element_type=jnp.float32))       # (B,N,dh)

    # Heads sit side-by-side on the lane axis -> one concat, then ONE out-proj matmul.
    attn_out = jnp.concatenate(head_outs, axis=-1).reshape(rows, inner)        # (B*N, inner)
    wo = wo_ref[0]                                    # (inner, dim)
    x = x + jnp.dot(attn_out.astype(wo.dtype), wo,
                    preferred_element_type=jnp.float32) + bo_ref[0]            # residual

    # ---------------- feed-forward: PreNorm -> Linear -> GELU -> Linear -> +residual -----
    xn = _layer_norm(x, ln2g_ref[0], ln2b_ref[0])
    w1 = w1_ref[0]
    hdn = jnp.dot(xn.astype(w1.dtype), w1,
                  preferred_element_type=jnp.float32) + b1_ref[0]
    hdn = 0.5 * hdn * (1.0 + lax.erf(hdn / math.sqrt(2.0)))    # exact erf GELU (nn.GELU default)
    w2 = w2_ref[0]
    x = x + jnp.dot(hdn.astype(w2.dtype), w2,
                    preferred_element_type=jnp.float32) + b2_ref[0]            # residual

    act_ref[...] = x                                  # carry to next layer

    @pl.when(l == pl.num_programs(0) - 1)
    def _():
        o_ref[...] = x.astype(o_ref.dtype)


# ---------------------------------------------------------------------------
# Host-side packing (call ONCE, reuse the packed pytree across forward calls)
# ---------------------------------------------------------------------------
def pack_params(params, *, heads, dim_head, mxu_dtype=jnp.float32):
    """Stack per-layer params along a leading depth axis.

    mxu_dtype: dtype of the matmul weights.  Use jnp.bfloat16 on v6e/v7x for MXU
    throughput / VMEM headroom; keep f32 for exact parity with an f32 reference.
    LayerNorm params and biases always stay f32 (elementwise path).
    """
    inner = heads * dim_head
    scale = dim_head ** (-0.5)
    depth = len(params)

    def stack_vec(key):                               # (depth, 1, width) — keeps the
        return jnp.stack([p[key] for p in params]).reshape(depth, 1, -1)  # (8,128)-safe block

    wqkv = jnp.stack([p["wqkv"] for p in params])     # (depth, dim, 3*inner)
    wqkv = wqkv.at[:, :, :inner].multiply(scale)      # bake softmax scale into Q columns

    return {
        "ln1_g": stack_vec("ln1_g"), "ln1_b": stack_vec("ln1_b"),
        "wqkv": wqkv.astype(mxu_dtype),
        "wo": jnp.stack([p["wout"] for p in params]).astype(mxu_dtype),   # (depth, inner, dim)
        "bo": stack_vec("bout"),
        "ln2_g": stack_vec("ln2_g"), "ln2_b": stack_vec("ln2_b"),
        "w1": jnp.stack([p["w1"] for p in params]).astype(mxu_dtype),     # (depth, dim, mlp)
        "b1": stack_vec("b1"),
        "w2": jnp.stack([p["w2"] for p in params]).astype(mxu_dtype),     # (depth, mlp, dim)
        "b2": stack_vec("b2"),
    }


def transformer_forward(x, packed, *, heads, dim_head):
    B, N, D = x.shape
    depth = packed["wqkv"].shape[0]
    rows = B * N

    kernel = functools.partial(_transformer_layer_kernel, heads=heads,
                               dim_head=dim_head, batch=B, seq=N)

    x2 = x.reshape(rows, D)                           # fold batch into the matmul M dim

    def layer_spec(arr):
        nd = arr.ndim                                 # block last-two dims == full array dims
        return pl.BlockSpec((1,) + arr.shape[1:],
                            lambda l, _nd=nd: (l,) + (0,) * (_nd - 1))

    inputs = (x2,
              packed["ln1_g"], packed["ln1_b"],
              packed["wqkv"], packed["wo"], packed["bo"],
              packed["ln2_g"], packed["ln2_b"],
              packed["w1"], packed["b1"], packed["w2"], packed["b2"])

    in_specs = [pl.BlockSpec((rows, D), lambda l: (0, 0))] + \
               [layer_spec(a) for a in inputs[1:]]

    out = pl.pallas_call(
        kernel,
        out_shape=jax.ShapeDtypeStruct((rows, D), x.dtype),
        grid=(depth,),                                # stream layers: weights double-buffered
        in_specs=in_specs,
        out_specs=pl.BlockSpec((rows, D), lambda l: (0, 0)),
        scratch_shapes=[pltpu.VMEM((rows, D), jnp.float32)],   # carried activation
        compiler_params=pltpu.CompilerParams(dimension_semantics=("arbitrary",)),
    )(*inputs)
    return out.reshape(B, N, D)


# ---------------------------------------------------------------------------
# Pure-JAX reference (silent correctness check)
# ---------------------------------------------------------------------------
def _reference_forward(x, params, *, heads, dim_head):
    def ln(v, g, b):
        mu = jnp.mean(v, axis=-1, keepdims=True)
        var = jnp.mean((v - mu) ** 2, axis=-1, keepdims=True)
        return (v - mu) / jnp.sqrt(var + 1e-5) * g + b

    B, N, D = x.shape
    inner = heads * dim_head
    scale = dim_head ** (-0.5)
    for p in params:
        xn = ln(x, p["ln1_g"], p["ln1_b"])
        qkv = xn @ p["wqkv"]
        q, k, v = jnp.split(qkv, 3, axis=-1)
        q = q.reshape(B, N, heads, dim_head).transpose(0, 2, 1, 3)
        k = k.reshape(B, N, heads, dim_head).transpose(0, 2, 1, 3)
        v = v.reshape(B, N, heads, dim_head).transpose(0, 2, 1, 3)
        dots = jnp.einsum("bhnd,bhmd->bhnm", q, k) * scale
        attn = jax.nn.softmax(dots, axis=-1)
        out = jnp.einsum("bhnm,bhmd->bhnd", attn, v)
        out = out.transpose(0, 2, 1, 3).reshape(B, N, inner)
        x = out @ p["wout"] + p["bout"] + x

        xn = ln(x, p["ln2_g"], p["ln2_b"])
        h = xn @ p["w1"] + p["b1"]
        h = 0.5 * h * (1.0 + lax.erf(h / math.sqrt(2.0)))
        x = h @ p["w2"] + p["b2"] + x
    return x


# ---------------------------------------------------------------------------
# Parameter init + main
# ---------------------------------------------------------------------------
def init_params(key, depth, dim, heads, dim_head, mlp_dim):
    inner = heads * dim_head
    params = []
    for _ in range(depth):
        key, *ks = jax.random.split(key, 11)
        params.append({
            "ln1_g": 1.0 + 0.1 * jax.random.normal(ks[0], (dim,), jnp.float32),
            "ln1_b": 0.1 * jax.random.normal(ks[1], (dim,), jnp.float32),
            "wqkv": jax.random.normal(ks[2], (dim, 3 * inner), jnp.float32) * 0.02,
            "wout": jax.random.normal(ks[3], (inner, dim), jnp.float32) * 0.02,
            "bout": jax.random.normal(ks[4], (dim,), jnp.float32) * 0.02,
            "ln2_g": 1.0 + 0.1 * jax.random.normal(ks[5], (dim,), jnp.float32),
            "ln2_b": 0.1 * jax.random.normal(ks[6], (dim,), jnp.float32),
            "w1": jax.random.normal(ks[7], (dim, mlp_dim), jnp.float32) * 0.02,
            "b1": jax.random.normal(ks[8], (mlp_dim,), jnp.float32) * 0.02,
            "w2": jax.random.normal(ks[9], (mlp_dim, dim), jnp.float32) * 0.02,
            "b2": jnp.zeros((dim,), jnp.float32),
        })
    return params


if __name__ == "__main__":
    # Small, self-consistent config: dim=32, depth=2, heads=4, dim_head=8, mlp_dim=64
    B, N = 2, 8
    DIM, DEPTH, HEADS, DIM_HEAD, MLP_DIM = 32, 2, 4, 8, 64

    key = jax.random.PRNGKey(0)
    kx, kp = jax.random.split(key)
    x = jax.random.normal(kx, (B, N, DIM), jnp.float32)
    params = init_params(kp, DEPTH, DIM, HEADS, DIM_HEAD, MLP_DIM)

    # Pack ONCE (hoisted out of the per-call path); f32 weights for exact parity here —
    # pass mxu_dtype=jnp.bfloat16 on v6e/v7x for real workloads.
    packed = pack_params(params, heads=HEADS, dim_head=DIM_HEAD, mxu_dtype=jnp.float32)

    out = transformer_forward(x, packed, heads=HEADS, dim_head=DIM_HEAD)
    out = jax.block_until_ready(out)

    ref = _reference_forward(x, params, heads=HEADS, dim_head=DIM_HEAD)
    assert out.shape == (B, N, DIM)
    assert jnp.allclose(out, ref, atol=1e-4, rtol=1e-4), "Pallas output mismatch vs reference"

    print("KERNEL_OK")
</pallas_src>

<mosaic_0001>
module attributes {stable_mosaic.version = 11 : i64} {
  func.func @_transformer_layer_kernel(%arg0: i32, %arg1: memref<16x32xf32, #tpu.memory_space<vmem>>, %arg2: memref<1x1x32xf32, #tpu.memory_space<vmem>>, %arg3: memref<1x1x32xf32, #tpu.memory_space<vmem>>, %arg4: memref<1x32x96xf32, #tpu.memory_space<vmem>>, %arg5: memref<1x32x32xf32, #tpu.memory_space<vmem>>, %arg6: memref<1x1x32xf32, #tpu.memory_space<vmem>>, %arg7: memref<1x1x32xf32, #tpu.memory_space<vmem>>, %arg8: memref<1x1x32xf32, #tpu.memory_space<vmem>>, %arg9: memref<1x32x64xf32, #tpu.memory_space<vmem>>, %arg10: memref<1x1x64xf32, #tpu.memory_space<vmem>>, %arg11: memref<1x64x32xf32, #tpu.memory_space<vmem>>, %arg12: memref<1x1x32xf32, #tpu.memory_space<vmem>>, %arg13: memref<16x32xf32, #tpu.memory_space<vmem>>, %arg14: memref<16x32xf32, #tpu.memory_space<vmem>>) attributes {dimension_semantics = [#tpu.dimension_semantics<arbitrary>], iteration_bounds = array<i64: 2>, scalar_prefetch = 0 : i64, scratch_operands = 1 : i64, tpu.core_type = #tpu.core_type<tc>, window_params = [{pipeline_mode = #tpu.pipeline_mode<synchronous>, transform_indices = @transform_0, window_bounds = array<i64: 16, 32>}, {transform_indices = @transform_1, window_bounds = array<i64: 1, 1, 32>}, {transform_indices = @transform_2, window_bounds = array<i64: 1, 1, 32>}, {transform_indices = @transform_3, window_bounds = array<i64: 1, 32, 96>}, {transform_indices = @transform_4, window_bounds = array<i64: 1, 32, 32>}, {transform_indices = @transform_5, window_bounds = array<i64: 1, 1, 32>}, {transform_indices = @transform_6, window_bounds = array<i64: 1, 1, 32>}, {transform_indices = @transform_7, window_bounds = array<i64: 1, 1, 32>}, {transform_indices = @transform_8, window_bounds = array<i64: 1, 32, 64>}, {transform_indices = @transform_9, window_bounds = array<i64: 1, 1, 64>}, {transform_indices = @transform_10, window_bounds = array<i64: 1, 64, 32>}, {transform_indices = @transform_11, window_bounds = array<i64: 1, 1, 32>}, {pipeline_mode = #tpu.pipeline_mode<synchronous>, transform_indices = @transform_12, window_bounds = array<i64: 16, 32>}]} {
    %c0_i32 = arith.constant 0 : i32
    %0 = arith.cmpi eq, %arg0, %c0_i32 : i32
    %1 = arith.extui %0 : i1 to i32
    %c0_i32_0 = arith.constant 0 : i32
    %2 = arith.cmpi ne, %1, %c0_i32_0 : i32
    scf.if %2 {
      %c0_70 = arith.constant 0 : index
      %c0_71 = arith.constant 0 : index
      %157 = vector.load %arg1[%c0_70, %c0_71] : memref<16x32xf32, #tpu.memory_space<vmem>>, vector<16x32xf32>
      %c0_72 = arith.constant 0 : index
      %c0_73 = arith.constant 0 : index
      %158 = vector.load %arg14[%c0_72, %c0_73] : memref<16x32xf32, #tpu.memory_space<vmem>>, vector<16x32xf32>
      tpu.vector_store %arg14[%c0_72, %c0_73], %157 {strides = array<i32>} : memref<16x32xf32, #tpu.memory_space<vmem>>, vector<16x32xf32>,
    } else {
    }
    %c0 = arith.constant 0 : index
    %c0_1 = arith.constant 0 : index
    %3 = vector.load %arg14[%c0, %c0_1] : memref<16x32xf32, #tpu.memory_space<vmem>>, vector<16x32xf32>
    %c0_2 = arith.constant 0 : index
    %c0_3 = arith.constant 0 : index
    %c0_4 = arith.constant 0 : index
    %4 = vector.load %arg2[%c0_2, %c0_3, %c0_4] : memref<1x1x32xf32, #tpu.memory_space<vmem>>, vector<1x1x32xf32>
    %5 = vector.shape_cast %4 : vector<1x1x32xf32> to vector<1x32xf32>
    %c0_5 = arith.constant 0 : index
    %c0_6 = arith.constant 0 : index
    %c0_7 = arith.constant 0 : index
    %6 = vector.load %arg3[%c0_5, %c0_6, %c0_7] : memref<1x1x32xf32, #tpu.memory_space<vmem>>, vector<1x1x32xf32>
    %7 = vector.shape_cast %6 : vector<1x1x32xf32> to vector<1x32xf32>
    %cst = arith.constant dense<0.000000e+00> : vector<16xf32>
    %8 = vector.multi_reduction <add>, %3, %cst [1] : vector<16x32xf32> to vector<16xf32>
    %9 = vector.shape_cast %8 : vector<16xf32> to vector<16x1xf32>
    %cst_8 = arith.constant 3.200000e+01 : f32
    %10 = vector.broadcast %cst_8 : f32 to vector<16x1xf32>
    %11 = arith.divf %9, %10 : vector<16x1xf32>
    %12 = vector.broadcast %11 : vector<16x1xf32> to vector<16x32xf32>
    %13 = arith.subf %3, %12 : vector<16x32xf32>
    %14 = arith.mulf %13, %13 : vector<16x32xf32>
    %cst_9 = arith.constant dense<0.000000e+00> : vector<16xf32>
    %15 = vector.multi_reduction <add>, %14, %cst_9 [1] : vector<16x32xf32> to vector<16xf32>
    %16 = vector.shape_cast %15 : vector<16xf32> to vector<16x1xf32>
    %cst_10 = arith.constant 3.200000e+01 : f32
    %17 = vector.broadcast %cst_10 : f32 to vector<16x1xf32>
    %18 = arith.divf %16, %17 : vector<16x1xf32>
    %19 = vector.broadcast %11 : vector<16x1xf32> to vector<16x32xf32>
    %20 = arith.subf %3, %19 : vector<16x32xf32>
    %cst_11 = arith.constant 9.99999974E-6 : f32
    %21 = vector.broadcast %cst_11 : f32 to vector<16x1xf32>
    %22 = arith.addf %18, %21 : vector<16x1xf32>
    %23 = math.rsqrt %22 : vector<16x1xf32>
    %24 = vector.broadcast %23 : vector<16x1xf32> to vector<16x32xf32>
    %25 = arith.mulf %20, %24 : vector<16x32xf32>
    %26 = vector.broadcast %5 : vector<1x32xf32> to vector<16x32xf32>
    %27 = arith.mulf %25, %26 : vector<16x32xf32>
    %28 = vector.broadcast %7 : vector<1x32xf32> to vector<16x32xf32>
    %29 = arith.addf %27, %28 : vector<16x32xf32>
    %c0_12 = arith.constant 0 : index
    %c0_13 = arith.constant 0 : index
    %c0_14 = arith.constant 0 : index
    %30 = vector.load %arg4[%c0_12, %c0_13, %c0_14] : memref<1x32x96xf32, #tpu.memory_space<vmem>>, vector<1x32x96xf32>
    %31 = vector.shape_cast %30 : vector<1x32x96xf32> to vector<32x96xf32>
    %cst_15 = arith.constant dense<0.000000e+00> : vector<16x96xf32>
    %32 = tpu.matmul %29, %31, %cst_15 {dimension_numbers = #tpu.dot_dimension_numbers<[1], [0], [0], [1], [0, 0, 1, 1], [], []>} : vector<16x32xf32>, vector<32x96xf32>, vector<16x96xf32> -> vector<16x96xf32>
    %33 = vector.shape_cast %32 : vector<16x96xf32> to vector<2x8x96xf32>
    %34 = vector.extract_strided_slice %33 {offsets = [0, 0, 0], sizes = [2, 8, 8], strides = [1, 1, 1]} : vector<2x8x96xf32> to vector<2x8x8xf32>
    %35 = vector.extract_strided_slice %33 {offsets = [0, 0, 32], sizes = [2, 8, 8], strides = [1, 1, 1]} : vector<2x8x96xf32> to vector<2x8x8xf32>
    %36 = vector.extract_strided_slice %33 {offsets = [0, 0, 64], sizes = [2, 8, 8], strides = [1, 1, 1]} : vector<2x8x96xf32> to vector<2x8x8xf32>
    "tpu.trace_start"() <{level = 10 : i32, message = "bnd,bmd->bnm"}> : () -> ()
    %cst_16 = arith.constant dense<0.000000e+00> : vector<2x8x8xf32>
    %37 = tpu.matmul %34, %35, %cst_16 {dimension_numbers = #tpu.dot_dimension_numbers<[2], [2], [1], [1], [0, 0, 0, 1, 1, 1], [0], [0]>} : vector<2x8x8xf32>, vector<2x8x8xf32>, vector<2x8x8xf32> -> vector<2x8x8xf32>
    "tpu.trace_stop"() : () -> ()
    %cst_17 = arith.constant dense<0xFF800000> : vector<2x8xf32>
    %38 = vector.multi_reduction <maximumf>, %37, %cst_17 [2] : vector<2x8x8xf32> to vector<2x8xf32>
    %39 = vector.shape_cast %38 : vector<2x8xf32> to vector<2x8x1xf32>
    %40 = vector.broadcast %39 : vector<2x8x1xf32> to vector<2x8x8xf32>
    %41 = arith.subf %37, %40 : vector<2x8x8xf32>
    %42 = math.exp %41 : vector<2x8x8xf32>
    %cst_18 = arith.constant dense<0.000000e+00> : vector<2x8xf32>
    %43 = vector.multi_reduction <add>, %42, %cst_18 [2] : vector<2x8x8xf32> to vector<2x8xf32>
    %44 = vector.shape_cast %43 : vector<2x8xf32> to vector<2x8x1xf32>
    %45 = tpu.reciprocal %44 : vector<2x8x1xf32> -> vector<2x8x1xf32>
    %46 = vector.broadcast %45 : vector<2x8x1xf32> to vector<2x8x8xf32>
    %47 = arith.mulf %42, %46 : vector<2x8x8xf32>
    "tpu.trace_start"() <{level = 10 : i32, message = "bnm,bmd->bnd"}> : () -> ()
    %cst_19 = arith.constant dense<0.000000e+00> : vector<2x8x8xf32>
    %48 = tpu.matmul %47, %36, %cst_19 {dimension_numbers = #tpu.dot_dimension_numbers<[2], [1], [1], [2], [0, 0, 0, 1, 1, 2], [0], [0]>} : vector<2x8x8xf32>, vector<2x8x8xf32>, vector<2x8x8xf32> -> vector<2x8x8xf32>
    "tpu.trace_stop"() : () -> ()
    %49 = vector.extract_strided_slice %33 {offsets = [0, 0, 8], sizes = [2, 8, 8], strides = [1, 1, 1]} : vector<2x8x96xf32> to vector<2x8x8xf32>
    %50 = vector.extract_strided_slice %33 {offsets = [0, 0, 40], sizes = [2, 8, 8], strides = [1, 1, 1]} : vector<2x8x96xf32> to vector<2x8x8xf32>
    %51 = vector.extract_strided_slice %33 {offsets = [0, 0, 72], sizes = [2, 8, 8], strides = [1, 1, 1]} : vector<2x8x96xf32> to vector<2x8x8xf32>
    "tpu.trace_start"() <{level = 10 : i32, message = "bnd,bmd->bnm"}> : () -> ()
    %cst_20 = arith.constant dense<0.000000e+00> : vector<2x8x8xf32>
    %52 = tpu.matmul %49, %50, %cst_20 {dimension_numbers = #tpu.dot_dimension_numbers<[2], [2], [1], [1], [0, 0, 0, 1, 1, 1], [0], [0]>} : vector<2x8x8xf32>, vector<2x8x8xf32>, vector<2x8x8xf32> -> vector<2x8x8xf32>
    "tpu.trace_stop"() : () -> ()
    %cst_21 = arith.constant dense<0xFF800000> : vector<2x8xf32>
    %53 = vector.multi_reduction <maximumf>, %52, %cst_21 [2] : vector<2x8x8xf32> to vector<2x8xf32>
    %54 = vector.shape_cast %53 : vector<2x8xf32> to vector<2x8x1xf32>
    %55 = vector.broadcast %54 : vector<2x8x1xf32> to vector<2x8x8xf32>
    %56 = arith.subf %52, %55 : vector<2x8x8xf32>
    %57 = math.exp %56 : vector<2x8x8xf32>
    %cst_22 = arith.constant dense<0.000000e+00> : vector<2x8xf32>
    %58 = vector.multi_reduction <add>, %57, %cst_22 [2] : vector<2x8x8xf32> to vector<2x8xf32>
    %59 = vector.shape_cast %58 : vector<2x8xf32> to vector<2x8x1xf32>
    %60 = tpu.reciprocal %59 : vector<2x8x1xf32> -> vector<2x8x1xf32>
    %61 = vector.broadcast %60 : vector<2x8x1xf32> to vector<2x8x8xf32>
    %62 = arith.mulf %57, %61 : vector<2x8x8xf32>
    "tpu.trace_start"() <{level = 10 : i32, message = "bnm,bmd->bnd"}> : () -> ()
    %cst_23 = arith.constant dense<0.000000e+00> : vector<2x8x8xf32>
    %63 = tpu.matmul %62, %51, %cst_23 {dimension_numbers = #tpu.dot_dimension_numbers<[2], [1], [1], [2], [0, 0, 0, 1, 1, 2], [0], [0]>} : vector<2x8x8xf32>, vector<2x8x8xf32>, vector<2x8x8xf32> -> vector<2x8x8xf32>
    "tpu.trace_stop"() : () -> ()
    %64 = vector.extract_strided_slice %33 {offsets = [0, 0, 16], sizes = [2, 8, 8], strides = [1, 1, 1]} : vector<2x8x96xf32> to vector<2x8x8xf32>
    %65 = vector.extract_strided_slice %33 {offsets = [0, 0, 48], sizes = [2, 8, 8], strides = [1, 1, 1]} : vector<2x8x96xf32> to vector<2x8x8xf32>
    %66 = vector.extract_strided_slice %33 {offsets = [0, 0, 80], sizes = [2, 8, 8], strides = [1, 1, 1]} : vector<2x8x96xf32> to vector<2x8x8xf32>
    "tpu.trace_start"() <{level = 10 : i32, message = "bnd,bmd->bnm"}> : () -> ()
    %cst_24 = arith.constant dense<0.000000e+00> : vector<2x8x8xf32>
    %67 = tpu.matmul %64, %65, %cst_24 {dimension_numbers = #tpu.dot_dimension_numbers<[2], [2], [1], [1], [0, 0, 0, 1, 1, 1], [0], [0]>} : vector<2x8x8xf32>, vector<2x8x8xf32>, vector<2x8x8xf32> -> vector<2x8x8xf32>
    "tpu.trace_stop"() : () -> ()
    %cst_25 = arith.constant dense<0xFF800000> : vector<2x8xf32>
    %68 = vector.multi_reduction <maximumf>, %67, %cst_25 [2] : vector<2x8x8xf32> to vector<2x8xf32>
    %69 = vector.shape_cast %68 : vector<2x8xf32> to vector<2x8x1xf32>
    %70 = vector.broadcast %69 : vector<2x8x1xf32> to vector<2x8x8xf32>
    %71 = arith.subf %67, %70 : vector<2x8x8xf32>
    %72 = math.exp %71 : vector<2x8x8xf32>
    %cst_26 = arith.constant dense<0.000000e+00> : vector<2x8xf32>
    %73 = vector.multi_reduction <add>, %72, %cst_26 [2] : vector<2x8x8xf32> to vector<2x8xf32>
    %74 = vector.shape_cast %73 : vector<2x8xf32> to vector<2x8x1xf32>
    %75 = tpu.reciprocal %74 : vector<2x8x1xf32> -> vector<2x8x1xf32>
    %76 = vector.broadcast %75 : vector<2x8x1xf32> to vector<2x8x8xf32>
    %77 = arith.mulf %72, %76 : vector<2x8x8xf32>
    "tpu.trace_start"() <{level = 10 : i32, message = "bnm,bmd->bnd"}> : () -> ()
    %cst_27 = arith.constant dense<0.000000e+00> : vector<2x8x8xf32>
    %78 = tpu.matmul %77, %66, %cst_27 {dimension_numbers = #tpu.dot_dimension_numbers<[2], [1], [1], [2], [0, 0, 0, 1, 1, 2], [0], [0]>} : vector<2x8x8xf32>, vector<2x8x8xf32>, vector<2x8x8xf32> -> vector<2x8x8xf32>
    "tpu.trace_stop"() : () -> ()
    %79 = vector.extract_strided_slice %33 {offsets = [0, 0, 24], sizes = [2, 8, 8], strides = [1, 1, 1]} : vector<2x8x96xf32> to vector<2x8x8xf32>
    %80 = vector.extract_strided_slice %33 {offsets = [0, 0, 56], sizes = [2, 8, 8], strides = [1, 1, 1]} : vector<2x8x96xf32> to vector<2x8x8xf32>
    %81 = vector.extract_strided_slice %33 {offsets = [0, 0, 88], sizes = [2, 8, 8], strides = [1, 1, 1]} : vector<2x8x96xf32> to vector<2x8x8xf32>
    "tpu.trace_start"() <{level = 10 : i32, message = "bnd,bmd->bnm"}> : () -> ()
    %cst_28 = arith.constant dense<0.000000e+00> : vector<2x8x8xf32>
    %82 = tpu.matmul %79, %80, %cst_28 {dimension_numbers = #tpu.dot_dimension_numbers<[2], [2], [1], [1], [0, 0, 0, 1, 1, 1], [0], [0]>} : vector<2x8x8xf32>, vector<2x8x8xf32>, vector<2x8x8xf32> -> vector<2x8x8xf32>
    "tpu.trace_stop"() : () -> ()
    %cst_29 = arith.constant dense<0xFF800000> : vector<2x8xf32>
    %83 = vector.multi_reduction <maximumf>, %82, %cst_29 [2] : vector<2x8x8xf32> to vector<2x8xf32>
    %84 = vector.shape_cast %83 : vector<2x8xf32> to vector<2x8x1xf32>
    %85 = vector.broadcast %84 : vector<2x8x1xf32> to vector<2x8x8xf32>
    %86 = arith.subf %82, %85 : vector<2x8x8xf32>
    %87 = math.exp %86 : vector<2x8x8xf32>
    %cst_30 = arith.constant dense<0.000000e+00> : vector<2x8xf32>
    %88 = vector.multi_reduction <add>, %87, %cst_30 [2] : vector<2x8x8xf32> to vector<2x8xf32>
    %89 = vector.shape_cast %88 : vector<2x8xf32> to vector<2x8x1xf32>
    %90 = tpu.reciprocal %89 : vector<2x8x1xf32> -> vector<2x8x1xf32>
    %91 = vector.broadcast %90 : vector<2x8x1xf32> to vector<2x8x8xf32>
    %92 = arith.mulf %87, %91 : vector<2x8x8xf32>
    "tpu.trace_start"() <{level = 10 : i32, message = "bnm,bmd->bnd"}> : () -> ()
    %cst_31 = arith.constant dense<0.000000e+00> : vector<2x8x8xf32>
    %93 = tpu.matmul %92, %81, %cst_31 {dimension_numbers = #tpu.dot_dimension_numbers<[2], [1], [1], [2], [0, 0, 0, 1, 1, 2], [0], [0]>} : vector<2x8x8xf32>, vector<2x8x8xf32>, vector<2x8x8xf32> -> vector<2x8x8xf32>
    "tpu.trace_stop"() : () -> ()
    %94 = tpu.concatenate %48, %63, %78, %93 in 2 : vector<2x8x8xf32>, vector<2x8x8xf32>, vector<2x8x8xf32>, vector<2x8x8xf32> -> vector<2x8x32xf32>
    %95 = vector.shape_cast %94 : vector<2x8x32xf32> to vector<16x32xf32>
    %c0_32 = arith.constant 0 : index
    %c0_33 = arith.constant 0 : index
    %c0_34 = arith.constant 0 : index
    %96 = vector.load %arg5[%c0_32, %c0_33, %c0_34] : memref<1x32x32xf32, #tpu.memory_space<vmem>>, vector<1x32x32xf32>
    %97 = vector.shape_cast %96 : vector<1x32x32xf32> to vector<32x32xf32>
    %cst_35 = arith.constant dense<0.000000e+00> : vector<16x32xf32>
    %98 = tpu.matmul %95, %97, %cst_35 {dimension_numbers = #tpu.dot_dimension_numbers<[1], [0], [0], [1], [0, 0, 1, 1], [], []>} : vector<16x32xf32>, vector<32x32xf32>, vector<16x32xf32> -> vector<16x32xf32>
    %99 = arith.addf %3, %98 : vector<16x32xf32>
    %c0_36 = arith.constant 0 : index
    %c0_37 = arith.constant 0 : index
    %c0_38 = arith.constant 0 : index
    %100 = vector.load %arg6[%c0_36, %c0_37, %c0_38] : memref<1x1x32xf32, #tpu.memory_space<vmem>>, vector<1x1x32xf32>
    %101 = vector.shape_cast %100 : vector<1x1x32xf32> to vector<1x32xf32>
    %102 = vector.broadcast %101 : vector<1x32xf32> to vector<16x32xf32>
    %103 = arith.addf %99, %102 : vector<16x32xf32>
    %c0_39 = arith.constant 0 : index
    %c0_40 = arith.constant 0 : index
    %c0_41 = arith.constant 0 : index
    %104 = vector.load %arg7[%c0_39, %c0_40, %c0_41] : memref<1x1x32xf32, #tpu.memory_space<vmem>>, vector<1x1x32xf32>
    %105 = vector.shape_cast %104 : vector<1x1x32xf32> to vector<1x32xf32>
    %c0_42 = arith.constant 0 : index
    %c0_43 = arith.constant 0 : index
    %c0_44 = arith.constant 0 : index
    %106 = vector.load %arg8[%c0_42, %c0_43, %c0_44] : memref<1x1x32xf32, #tpu.memory_space<vmem>>, vector<1x1x32xf32>
    %107 = vector.shape_cast %106 : vector<1x1x32xf32> to vector<1x32xf32>
    %cst_45 = arith.constant dense<0.000000e+00> : vector<16xf32>
    %108 = vector.multi_reduction <add>, %103, %cst_45 [1] : vector<16x32xf32> to vector<16xf32>
    %109 = vector.shape_cast %108 : vector<16xf32> to vector<16x1xf32>
    %cst_46 = arith.constant 3.200000e+01 : f32
    %110 = vector.broadcast %cst_46 : f32 to vector<16x1xf32>
    %111 = arith.divf %109, %110 : vector<16x1xf32>
    %112 = vector.broadcast %111 : vector<16x1xf32> to vector<16x32xf32>
    %113 = arith.subf %103, %112 : vector<16x32xf32>
    %114 = arith.mulf %113, %113 : vector<16x32xf32>
    %cst_47 = arith.constant dense<0.000000e+00> : vector<16xf32>
    %115 = vector.multi_reduction <add>, %114, %cst_47 [1] : vector<16x32xf32> to vector<16xf32>
    %116 = vector.shape_cast %115 : vector<16xf32> to vector<16x1xf32>
    %cst_48 = arith.constant 3.200000e+01 : f32
    %117 = vector.broadcast %cst_48 : f32 to vector<16x1xf32>
    %118 = arith.divf %116, %117 : vector<16x1xf32>
    %119 = vector.broadcast %111 : vector<16x1xf32> to vector<16x32xf32>
    %120 = arith.subf %103, %119 : vector<16x32xf32>
    %cst_49 = arith.constant 9.99999974E-6 : f32
    %121 = vector.broadcast %cst_49 : f32 to vector<16x1xf32>
    %122 = arith.addf %118, %121 : vector<16x1xf32>
    %123 = math.rsqrt %122 : vector<16x1xf32>
    %124 = vector.broadcast %123 : vector<16x1xf32> to vector<16x32xf32>
    %125 = arith.mulf %120, %124 : vector<16x32xf32>
    %126 = vector.broadcast %105 : vector<1x32xf32> to vector<16x32xf32>
    %127 = arith.mulf %125, %126 : vector<16x32xf32>
    %128 = vector.broadcast %107 : vector<1x32xf32> to vector<16x32xf32>
    %129 = arith.addf %127, %128 : vector<16x32xf32>
    %c0_50 = arith.constant 0 : index
    %c0_51 = arith.constant 0 : index
    %c0_52 = arith.constant 0 : index
    %130 = vector.load %arg9[%c0_50, %c0_51, %c0_52] : memref<1x32x64xf32, #tpu.memory_space<vmem>>, vector<1x32x64xf32>
    %131 = vector.shape_cast %130 : vector<1x32x64xf32> to vector<32x64xf32>
    %cst_53 = arith.constant dense<0.000000e+00> : vector<16x64xf32>
    %132 = tpu.matmul %129, %131, %cst_53 {dimension_numbers = #tpu.dot_dimension_numbers<[1], [0], [0], [1], [0, 0, 1, 1], [], []>} : vector<16x32xf32>, vector<32x64xf32>, vector<16x64xf32> -> vector<16x64xf32>
    %c0_54 = arith.constant 0 : index
    %c0_55 = arith.constant 0 : index
    %c0_56 = arith.constant 0 : index
    %133 = vector.load %arg10[%c0_54, %c0_55, %c0_56] : memref<1x1x64xf32, #tpu.memory_space<vmem>>, vector<1x1x64xf32>
    %134 = vector.shape_cast %133 : vector<1x1x64xf32> to vector<1x64xf32>
    %135 = vector.broadcast %134 : vector<1x64xf32> to vector<16x64xf32>
    %136 = arith.addf %132, %135 : vector<16x64xf32>
    %cst_57 = arith.constant 5.000000e-01 : f32
    %137 = vector.broadcast %cst_57 : f32 to vector<16x64xf32>
    %138 = arith.mulf %137, %136 : vector<16x64xf32>
    %cst_58 = arith.constant 1.41421354 : f32
    %139 = vector.broadcast %cst_58 : f32 to vector<16x64xf32>
    %140 = arith.divf %136, %139 : vector<16x64xf32>
    %141 = math.erf %140 : vector<16x64xf32>
    %cst_59 = arith.constant 1.000000e+00 : f32
    %142 = vector.broadcast %cst_59 : f32 to vector<16x64xf32>
    %143 = arith.addf %142, %141 : vector<16x64xf32>
    %144 = arith.mulf %138, %143 : vector<16x64xf32>
    %c0_60 = arith.constant 0 : index
    %c0_61 = arith.constant 0 : index
    %c0_62 = arith.constant 0 : index
    %145 = vector.load %arg11[%c0_60, %c0_61, %c0_62] : memref<1x64x32xf32, #tpu.memory_space<vmem>>, vector<1x64x32xf32>
    %146 = vector.shape_cast %145 : vector<1x64x32xf32> to vector<64x32xf32>
    %cst_63 = arith.constant dense<0.000000e+00> : vector<16x32xf32>
    %147 = tpu.matmul %144, %146, %cst_63 {dimension_numbers = #tpu.dot_dimension_numbers<[1], [0], [0], [1], [0, 0, 1, 1], [], []>} : vector<16x64xf32>, vector<64x32xf32>, vector<16x32xf32> -> vector<16x32xf32>
    %148 = arith.addf %103, %147 : vector<16x32xf32>
    %c0_64 = arith.constant 0 : index
    %c0_65 = arith.constant 0 : index
    %c0_66 = arith.constant 0 : index
    %149 = vector.load %arg12[%c0_64, %c0_65, %c0_66] : memref<1x1x32xf32, #tpu.memory_space<vmem>>, vector<1x1x32xf32>
    %150 = vector.shape_cast %149 : vector<1x1x32xf32> to vector<1x32xf32>
    %151 = vector.broadcast %150 : vector<1x32xf32> to vector<16x32xf32>
    %152 = arith.addf %148, %151 : vector<16x32xf32>
    %c0_67 = arith.constant 0 : index
    %c0_68 = arith.constant 0 : index
    %153 = vector.load %arg14[%c0_67, %c0_68] : memref<16x32xf32, #tpu.memory_space<vmem>>, vector<16x32xf32>
    tpu.vector_store %arg14[%c0_67, %c0_68], %152 {strides = array<i32>} : memref<16x32xf32, #tpu.memory_space<vmem>>, vector<16x32xf32>,
    %c1_i32 = arith.constant 1 : i32
    %154 = arith.cmpi eq, %arg0, %c1_i32 : i32
    %155 = arith.extui %154 : i1 to i32
    %c0_i32_69 = arith.constant 0 : i32
    %156 = arith.cmpi ne, %155, %c0_i32_69 : i32
    scf.if %156 {
      %c0_70 = arith.constant 0 : index
      %c0_71 = arith.constant 0 : index
      %157 = vector.load %arg13[%c0_70, %c0_71] : memref<16x32xf32, #tpu.memory_space<vmem>>, vector<16x32xf32>
      tpu.vector_store %arg13[%c0_70, %c0_71], %152 {strides = array<i32>} : memref<16x32xf32, #tpu.memory_space<vmem>>, vector<16x32xf32>,
    } else {
    }
    return
  }
  func.func @transform_0(%arg0: i32) -> (i32, i32) {
    %c0_i32 = arith.constant 0 : i32
    %c0_i32_0 = arith.constant 0 : i32
    %c0_i32_1 = arith.constant 0 : i32
    return %c0_i32, %c0_i32_0 : i32, i32
  }
  func.func @transform_1(%arg0: i32) -> (i32, i32, i32) {
    %c0_i32 = arith.constant 0 : i32
    %c0_i32_0 = arith.constant 0 : i32
    %c0_i32_1 = arith.constant 0 : i32
    return %arg0, %c0_i32, %c0_i32_0 : i32, i32, i32
  }
  func.func @transform_2(%arg0: i32) -> (i32, i32, i32) {
    %c0_i32 = arith.constant 0 : i32
    %c0_i32_0 = arith.constant 0 : i32
    %c0_i32_1 = arith.constant 0 : i32
    return %arg0, %c0_i32, %c0_i32_0 : i32, i32, i32
  }
  func.func @transform_3(%arg0: i32) -> (i32, i32, i32) {
    %c0_i32 = arith.constant 0 : i32
    %c0_i32_0 = arith.constant 0 : i32
    %c0_i32_1 = arith.constant 0 : i32
    return %arg0, %c0_i32, %c0_i32_0 : i32, i32, i32
  }
  func.func @transform_4(%arg0: i32) -> (i32, i32, i32) {
    %c0_i32 = arith.constant 0 : i32
    %c0_i32_0 = arith.constant 0 : i32
    %c0_i32_1 = arith.constant 0 : i32
    return %arg0, %c0_i32, %c0_i32_0 : i32, i32, i32
  }
  func.func @transform_5(%arg0: i32) -> (i32, i32, i32) {
    %c0_i32 = arith.constant 0 : i32
    %c0_i32_0 = arith.constant 0 : i32
    %c0_i32_1 = arith.constant 0 : i32
    return %arg0, %c0_i32, %c0_i32_0 : i32, i32, i32
  }
  func.func @transform_6(%arg0: i32) -> (i32, i32, i32) {
    %c0_i32 = arith.constant 0 : i32
    %c0_i32_0 = arith.constant 0 : i32
    %c0_i32_1 = arith.constant 0 : i32
    return %arg0, %c0_i32, %c0_i32_0 : i32, i32, i32
  }
  func.func @transform_7(%arg0: i32) -> (i32, i32, i32) {
    %c0_i32 = arith.constant 0 : i32
    %c0_i32_0 = arith.constant 0 : i32
    %c0_i32_1 = arith.constant 0 : i32
    return %arg0, %c0_i32, %c0_i32_0 : i32, i32, i32
  }
  func.func @transform_8(%arg0: i32) -> (i32, i32, i32) {
    %c0_i32 = arith.constant 0 : i32
    %c0_i32_0 = arith.constant 0 : i32
    %c0_i32_1 = arith.constant 0 : i32
    return %arg0, %c0_i32, %c0_i32_0 : i32, i32, i32
  }
  func.func @transform_9(%arg0: i32) -> (i32, i32, i32) {
    %c0_i32 = arith.constant 0 : i32
    %c0_i32_0 = arith.constant 0 : i32
    %c0_i32_1 = arith.constant 0 : i32
    return %arg0, %c0_i32, %c0_i32_0 : i32, i32, i32
  }
  func.func @transform_10(%arg0: i32) -> (i32, i32, i32) {
    %c0_i32 = arith.constant 0 : i32
    %c0_i32_0 = arith.constant 0 : i32
    %c0_i32_1 = arith.constant 0 : i32
    return %arg0, %c0_i32, %c0_i32_0 : i32, i32, i32
  }
  func.func @transform_11(%arg0: i32) -> (i32, i32, i32) {
    %c0_i32 = arith.constant 0 : i32
    %c0_i32_0 = arith.constant 0 : i32
    %c0_i32_1 = arith.constant 0 : i32
    return %arg0, %c0_i32, %c0_i32_0 : i32, i32, i32
  }
  func.func @transform_12(%arg0: i32) -> (i32, i32) {
    %c0_i32 = arith.constant 0 : i32
    %c0_i32_0 = arith.constant 0 : i32
    %c0_i32_1 = arith.constant 0 : i32
    return %c0_i32, %c0_i32_0 : i32, i32
  }
}

</mosaic_0001>

<bundles_post_ra>
// kernel: tpu_custom_call.1
= control target key start
LH: loop header
LB: loop body
LE: loop exit
PB: predicated region body
PF: predicated region fallthrough
CT: control target
= control target key end

     0   :  { %s2795_s0 = inlined_call_operand.hbm [shape: f32[16,32], index: 0, kind: input, shape index: {}]   ;;  %s2796_s1 = inlined_call_operand.hbm [shape: f32[2,1,32], index: 1, kind: input, shape index: {}]   ;;  %s2797_s2 = inlined_call_operand.hbm [shape: f32[2,1,32], index: 2, kind: input, shape index: {}]   ;;  %s2798_s3 = inlined_call_operand.vmem [shape: f32[2,32,96], index: 3, kind: input, shape index: {}]   ;;  %s2799_s4 = inlined_call_operand.vmem [shape: f32[2,32,32], index: 4, kind: input, shape index: {}]   ;;  %s2800_s5 = inlined_call_operand.vmem [shape: f32[2,1,32], index: 5, kind: input, shape index: {}]   ;;  %s2801_s6 = inlined_call_operand.vmem [shape: f32[2,1,32], index: 6, kind: input, shape index: {}]   ;;  %s2802_s7 = inlined_call_operand.hbm [shape: f32[2,1,32], index: 7, kind: input, shape index: {}]   ;;  %s2803_s8 = inlined_call_operand.vmem [shape: f32[2,32,64], index: 8, kind: input, shape index: {}]   ;;  %s2804_s9 = inlined_call_operand.vmem [shape: f32[2,1,64], index: 9, kind: input, shape index: {}]   ;;  %s2805_s10 = inlined_call_operand.vmem [shape: f32[2,64,32], index: 10, kind: input, shape index: {}]   ;;  %s2806_s11 = inlined_call_operand.vmem [shape: f32[2,1,32], index: 11, kind: input, shape index: {}]   ;;  %s2807_s12 = inlined_call_operand.hbm [shape: f32[16,32], index: 12, kind: output, shape index: {}]  }
   0x1   :  { %2811 = sst [smem:[#allocation19_spill]] %s2795_s0 }
   0x2   :  { %2812 = sst [smem:[#allocation20_spill]] %s2796_s1 }
   0x3   :  { %2813 = sst [smem:[#allocation21_spill]] %s2797_s2 }
   0x4   :  { %2814 = sst [smem:[#allocation22_spill]] %s2806_s11 }
   0x5   :  { %2815 = sst [smem:[#allocation23_spill]] %s2807_s12 }
   0x6   :  { %17 = vsyncpa [#allocation4], 0 }
   0x7   :  { %18 = vsyncpa [#allocation7], 0 }
   0x8   :  { %20 = vsyncpa [#allocation7 + $0x1], 0 }
   0x9   :  { %21 = vsyncpa [#allocation10], 0 }
   0xa   :  { %23 = vsyncpa [#allocation10 + $0x1], 0 }
   0xb   :  { %24 = vsyncpa [#allocation5], 0  ;;  %s2350_s21 = smov 0   ;;  %s2352_s22 = smov 0  }
   0xc   :  { %s2354_s23 = smov 0   ;;  %s2356_s24 = smov 0  }
   0xd LB: > { %2816 = sst [smem:[#allocation16_spill]] %s2258_s23  ;;  %s2371_s25 = sadd.s32 1, %s2262_s24   ;;  %s2262_s24 = sphi %s2356_s24, %s2832_s24   ;;  %s2258_s23 = sphi %s2354_s23, %s2834_s23   ;;  %s2254_s22 = sphi %s2352_s22, %s2836_s22   ;;  %s2250_s21 = sphi %s2350_s21, %s2835_s21  }
   0xe   : > { %2817 = sst [smem:[#allocation17_spill]] %s2371_s25  ;;  %s58_s26 = sadd.s32 1, %s2258_s23 }
   0xf   : > { %s55_s27 = ssub.s32 %s2262_s24, %s2371_s25  ;;  %p65_p0 = scmp.ne.s32.totalorder %s2258_s23, %s2254_s22 }
  0x10   : > { %p56_p1 = scmp.eq.s32.totalorder %s55_s27, 0  ;;  %p66_p2 = scmp.eq.s32.totalorder %s2262_s24, 0 }
  0x11   : > { %p71_p3 = scmp.ne.s32.totalorder %s2254_s22, %s2250_s21  ;;  %p1956_p5 = scmp.lt.s32.totalorder %s2262_s24, 2 }
  0x12   : > { %s2382_s28 = scalar_select %p56_p1, %s2258_s23, %s58_s26  }
  0x13   : > { %p67_p4 = por %p66_p2, %p65_p0  ;;  %s390_s29 = sand.u32 1, %s2262_s24  }
  0x14   : > { %2818 = sst [smem:[#allocation18_spill]] %s2382_s28  ;;  %s2387_s30 = sand.u32 1, %s2258_s23  }
  0x15   : > { %s2819_s1 = sld [smem:[#allocation20_spill]]  ;;  %s393_s16 = scalar_lea.vmem [#allocation6], %s2387_s30 }
  0x16   : > { %s400_s17 = sshll.u32 %s393_s16, 4  ;;  %p2394_p6 = pnand %p1956_p5, %p67_p4  ;;  %s401_s17 = int_to_ptr.vmem [resolvable:$true] %s400_s17 }
  0x17   : > { %s2399_s20 = sadd.s32 4294967295, %s2262_s24   ;;  %p1870_p7 = scmp.ge.s32.totalorder %s2262_s24, 1 }
  0x18   : > { %p72_p8 = scmp.eq.s32.totalorder %s2399_s20, 0  ;;  %s2403_s26 = scalar_lea.sflag [#allocation7], %s390_s29 }
  0x19   : > { %p2072_p10 = pneg %p2394_p6 }
  0x1b   : > { %s396_s15 = scalar_lea.hbm %s2819_s1, %s2262_s24  ;;  %s2075_s16 = scalar_lea.hbm %s2819_s1, 2 }
  0x1c   : > { %s398_s18 = sshll.u32 %s396_s15, 4  ;;  %s399_s18 = int_to_ptr.hbm [resolvable:$true] %s398_s18 }
  0x1d   : > { %s2068_s27 = sshra.s32 %s399_s18, 4  ;;  %s2069_s27 = int_to_ptr.hbm [resolvable:$true] %s2068_s27 }
  0x1e   : > { %s2070_s13 = scalar_lea.hbm %s2069_s27, 1  ;;  %p2076_p13 = scmp.lt.s32.totalorder %s2069_s27, %s2819_s1 }
  0x1f   : > { %p2071_p9 = scmp.ne.s32.totalorder %s2069_s27, %s2070_s13  ;;  %p2077_p0 = scmp.lt.s32.totalorder %s2075_s16, %s2070_s13 }
  0x21   : > { %p2073_p11 = pnand %p2072_p10, %p2071_p9  ;;  %p2078_p1 = por %p2077_p0, %p2076_p13 }
  0x23   : > { %p2074_p12 = pneg %p2073_p11 }
  0x25   : > { %p2079_p2 = pnand %p2078_p1, %p2074_p12 }
  0x27   : > { %2082 = shalt.err (!%p2079_p2)
}
  0x28   : > { %1948 = dma.hbm_to_vmem [thread:$0]  (!%p2394_p6), %s399_s18, 16, %s401_s17, %s2403_s26  }
  0x29   : > { %p2424_p4 = por %p72_p8, %p71_p3  ;;  %p363_p5 = scmp.lt.s32.totalorder %s2262_s24, 3 }
  0x2a   : > { %p1871_p9 = scmp.ne.s32.totalorder %s2399_s20, 0  ;;  %s2822_s0 = sld [smem:[#allocation19_spill]] }
  0x2b   : > { %p2435_p11 = pnand %p1870_p7, %p363_p5  ;;  %s2264_s21 = smov [#allocation3]  }
  0x2c   : > { %s376_s17 = sshll.u32 %s2264_s21, 4  ;;  %s2824_s2 = sld [smem:[#allocation21_spill]]  ;;  %s377_s17 = int_to_ptr.vmem [resolvable:$true] %s376_s17 }
  0x2d   : > { %p1941_p12 = pneg %p2435_p11  ;;  %s410_s16 = scalar_lea.vmem [#allocation8], %s2387_s30 }
  0x2e   : > { %s417_s28 = sshll.u32 %s410_s16, 4  ;;  %s2266_s1 = smov 8   ;;  %s418_s28 = int_to_ptr.vmem [resolvable:$true] %s417_s28 }
  0x2f   : > { %p1942_p3 = pnand %p1941_p12, %p72_p8 }
  0x30   : > { %s374_s27 = sshll.u32 %s2822_s0, 4  ;;  %s2265_s0 = smov 128   ;;  %s375_s27 = int_to_ptr.hbm [resolvable:$true] %s374_s27 }
  0x31   : > { %1944 = dma.hbm_to_vmem [thread:$0]  (!%p1942_p3), %s375_s27, 256, %s377_s17, [#allocation4], %s2265_s0, %s2265_s0, %s2266_s1  }
  0x32   : > { %s413_s15 = scalar_lea.hbm %s2824_s2, %s2262_s24  ;;  %s2135_s18 = scalar_lea.hbm %s2824_s2, 2 }
  0x33   : > { %s415_s29 = sshll.u32 %s413_s15, 4  ;;  %s416_s29 = int_to_ptr.hbm [resolvable:$true] %s415_s29 }
  0x34   : > { %s2128_s25 = sshra.s32 %s416_s29, 4  ;;  %s2129_s25 = int_to_ptr.hbm [resolvable:$true] %s2128_s25 }
  0x35   : > { %s2130_s12 = scalar_lea.hbm %s2129_s25, 1  ;;  %p2136_p1 = scmp.lt.s32.totalorder %s2129_s25, %s2824_s2 }
  0x36   : > { %p2131_p7 = scmp.ne.s32.totalorder %s2129_s25, %s2130_s12  ;;  %p2137_p2 = scmp.lt.s32.totalorder %s2135_s18, %s2130_s12 }
  0x38   : > { %p2133_p13 = pnand %p2131_p7, %p2072_p10  ;;  %p2138_p5 = por %p2137_p2, %p2136_p1 }
  0x3a   : > { %p2134_p0 = pneg %p2133_p13 }
  0x3c   : > { %p2139_p12 = pnand %p2138_p5, %p2134_p0 }
  0x3e   : > { %2142 = shalt.err (!%p2139_p12)
}
  0x3f   : > { %1951 = dma.hbm_to_vmem [thread:$0]  (!%p2394_p6), %s416_s29, 16, %s418_s28, %s2403_s26  }
  0x40   : > { %s458_s11 = scalar_lea.hbm %s2802_s7, %s2262_s24  ;;  %s455_s27 = scalar_lea.vmem [#allocation9], %s2387_s30 }
  0x41   : > { %s462_s17 = sshll.u32 %s455_s27, 4  ;;  %s460_s15 = sshll.u32 %s458_s11, 4  ;;  %s463_s17 = int_to_ptr.vmem [resolvable:$true] %s462_s17  ;;  %s461_s15 = int_to_ptr.hbm [resolvable:$true] %s460_s15 }
  0x42   : > { %s453_s12 = scalar_lea.sflag [#allocation10], %s2387_s30  ;;  %s2158_s25 = sshra.s32 %s461_s15, 4  ;;  %s2159_s25 = int_to_ptr.hbm [resolvable:$true] %s2158_s25 }
  0x43   : > { %s2160_s21 = scalar_lea.hbm %s2159_s25, 1  ;;  %s2165_s28 = scalar_lea.hbm %s2802_s7, 2 }
  0x44   : > { %p2161_p3 = scmp.ne.s32.totalorder %s2159_s25, %s2160_s21  ;;  %p2166_p0 = scmp.lt.s32.totalorder %s2159_s25, %s2802_s7 }
  0x45   : > { %p2167_p1 = scmp.lt.s32.totalorder %s2165_s28, %s2160_s21 }
  0x46   : > { %p2163_p7 = pnand %p2161_p3, %p2072_p10 }
  0x47   : > { %p2168_p2 = por %p2167_p1, %p2166_p0 }
  0x48   : > { %p2164_p13 = pneg %p2163_p7 }
  0x4a   : > { %p2169_p5 = pnand %p2168_p2, %p2164_p13 }
  0x4c   : > { %2172 = shalt.err (!%p2169_p5)
}
  0x4d   : > { %1954 = dma.hbm_to_vmem [thread:$0]  (!%p2394_p6), %s461_s15, 16, %s463_s17, %s453_s12  }
  0x4e   : > { %499 = sbr.rel (%p2435_p11) target bundleno = 2427 (0x97b), region = 68 }
  0x53   : > { %2233 = dma.done.wait (%p72_p8), [#allocation4], 256  }
  0x54   : > { %2235 = vsyncadd (%p72_p8), [#allocation4], 4294967040  ;;  %s506_s30 = sand.u32 1, %s2399_s20   ;;  %s2485_s14 = sand.u32 1, %s2254_s22  }
  0x55   : > { %s507_s16 = scalar_lea.sflag [#allocation7], %s506_s30 }
  0x56   : > { %2237 = dma.done.wait (%p2424_p4), %s507_s16, 32  }
  0x57   : > { %2239 = vsyncadd (%p2424_p4), %s507_s16, 4294967264  ;;  %s525_s13 = scalar_lea.sflag [#allocation10], %s2485_s14 }
  0x58   : > { %2241 = dma.done.wait (%p2424_p4), %s525_s13, 16  }
  0x59   : > { %2243 = vsyncadd (%p2424_p4), %s525_s13, 4294967280  ;;  %p603_p6 = scmp.lt.s32.totalorder %s2399_s20, 1  ;;  %s2825_s2 = sld [smem:[#allocation22_spill]] }
  0x5b   : > { %s2501_s11 = scalar_select %p603_p6, %s2399_s20, 1 }
  0x5d   : > { %s1923_s27 = sshll.u32 %s2501_s11, 5  ;;  %s618_s30 = scalar_lea.vmem %s2801_s6, %s2501_s11 }
  0x5e   : > { %s2511_s23 = scalar_lea.vmem %s2798_s3, %s1923_s27  ;;  %s2516_s28 = scalar_lea.vmem %s2799_s4, %s1923_s27 }
  0x5f   : > { %s2525_s1 = scalar_lea.vmem %s2803_s8, %s1923_s27  ;;  %s626_s25 = scalar_lea.vmem %s2804_s9, %s2501_s11 }
  0x60   : > { %s1926_s21 = sshll.u32 %s2501_s11, 6  ;;  %s634_s29 = scalar_lea.vmem %s2825_s2, %s2501_s11 }
  0x61   : > { %s2535_s18 = scalar_lea.vmem %s2805_s10, %s1926_s21  ;;  %638 = sbr.rel (%p1871_p9) target bundleno = 105 (0x69), region = 88 }
  0x66   : > { %v639_v0 = vld [vmem:[#allocation3] sm:$0xff]  ;;  %vm641_vm0 = vcmask 261120   ;;  %v640_v1 = vld [vmem:[#allocation3 + $0x8] sm:$0xff] }
  0x67   : > { %642 = vst.msk [vmem:[#allocation2] sm:$0xff] %vm641_vm0, %v639_v0 }
  0x68   : > { %643 = vst.msk [vmem:[#allocation2 + $0x8] sm:$0xff] %vm641_vm0, %v640_v1 }
  0x69 PF: > { %vm648_vm1 = vcmask 261120   ;;  %v2267_v6 = vmov 32.0   ;;  %v713_v23 = vld [vmem:[%s2511_s23 + $0x18] sm:$0xff]  ;;  %v712_v24 = vld [vmem:[%s2511_s23 + $0x10] sm:$0xff]  ;;  %v711_v25 = vld [vmem:[%s2511_s23 + $0x8] sm:$0xff]  ;;  %s2826_s2 = scalar_lea.vmem [#allocation6], %s2485_s14 }
  0x6a   : > { %2020 = vrcp.f32 %v2267_v6  ;;  %732 = vmatpush.msra.mxu0 %v713_v23  ;;  %v710_v26 = vld [vmem:[%s2511_s23] sm:$0xff]  ;;  %s2827_s0 = scalar_lea.vmem [#allocation8], %s2485_s14  ;;  %s2268_s19 = smov 64   ;;  %vm746_vm9 = vcmask 64512  }
  0x6b   : > { %v2013_v45 = vld [vmem:[%s2826_s2] ss:$0 sm:$0xff]  ;;  %s2269_s27 = smov 96   ;;  %s2270_s12 = smov 80  }
  0x6c   : > { %733 = vmatpush.msra.mxu0 %v712_v24  ;;  %v2014_v49 = vld [vmem:[%s2827_s0] ss:$0 sm:$0xff]  ;;  %s2271_s23 = smov 88   ;;  %s2272_s24 = smov 112  }
  0x6d   : > { %s2273_s16 = smov 104   ;;  %s2274_s13 = smov 120  }
  0x6e   : > { %v2543_v2 = vld [vmem:[#allocation2] sm:$0xff]  ;;  %734 = vmatpush.msra.mxu0 %v711_v25  ;;  %s2275_s17 = smov 72   ;;  %s2276_s15 = smov 56  }
  0x6f   : > { %v2545_v3 = vld [vmem:[#allocation2 + $0x8] sm:$0xff]  ;;  %v649_v4 = vsel %vm648_vm1, %v2543_v2, 0.0  ;;  %s2277_s21 = smov 48   ;;  %s2278_s26 = smov 40  }
  0x70   : > { %v652_v5 = vsel %vm648_vm1, %v2545_v3, 0.0  ;;  %650 = vadd.xlane.f32.xlu0 %v649_v4  ;;  %v2021_v7 = vpop.eup %2020  ;;  %735 = vmatpush.msra.mxu0 %v710_v26  ;;  %s2279_s2 = smov 8   ;;  %s2280_s0 = smov 16  }
  0x71   : > { %653 = vadd.xlane.f32.xlu1 %v652_v5  ;;  %v656_v8 = vmul.f32 32.0, %v2021_v7  ;;  %vm660_vm2 = vweird.f32 %v2021_v7  ;;  %p1918_p8 = scmp.ne.s32.totalorder %s2399_s20, 1 }
  0x73   : > { %v657_v9 = vsub.f32 1.0, %v656_v8 }
  0x75   : > { %v658_v10 = vmul.f32 %v2021_v7, %v657_v9 }
  0x77   : > { %v659_v11 = vadd.f32 %v2021_v7, %v658_v10 }
  0x79   : > { %v2551_v12 = vsel %vm660_vm2, %v2021_v7, %v659_v11 }
  0xe3   : > { %v651_v13 = vpop.xlane.xlu0 %650 }
  0xe4   : > { %v654_v14 = vpop.xlane.xlu1 %653  ;;  %v662_v15 = vmul.f32 %v2551_v12, %v651_v13 }
  0xe5   : > { %v663_v16 = vmul.f32 %v2551_v12, %v654_v14 }
  0xe6   : > { %v664_v17 = vsub.f32 %v2543_v2, %v662_v15 }
  0xe7   : > { %v665_v18 = vsub.f32 %v2545_v3, %v663_v16 }
  0xe8   : > { %v666_v19 = vmul.f32 %v664_v17, %v664_v17 }
  0xe9   : > { %v667_v20 = vmul.f32 %v665_v18, %v665_v18 }
  0xea   : > { %v668_v21 = vsel %vm648_vm1, %v666_v19, 0.0 }
  0xeb   : > { %v671_v22 = vsel %vm648_vm1, %v667_v20, 0.0  ;;  %669 = vadd.xlane.f32.xlu0 %v668_v21 }
  0xec   : > { %672 = vadd.xlane.f32.xlu2 %v671_v22 }
 0x15e   : > { %v670_v27 = vpop.xlane.xlu0 %669 }
 0x15f   : > { %v673_v28 = vpop.xlane.xlu2 %672  ;;  %v674_v29 = vmul.f32 %v670_v27, %v2551_v12 }
 0x160   : > { %v675_v30 = vmul.f32 %v673_v28, %v2551_v12 }
 0x161   : > { %v676_v31 = vadd.f32 1e-05, %v674_v29 }
 0x162   : > { %v677_v32 = vadd.f32 1e-05, %v675_v30 }
 0x163   : > { %2022 = vrsqrt.f32 %v676_v31  ;;  %vm684_vm6 = vweird.f32 %v676_v31 }
 0x164   : > { %2024 = vrsqrt.f32 %v677_v32  ;;  %vm694_vm3 = vweird.f32 %v677_v32 }
 0x169   : > { %v2023_v33 = vpop.eup %2022 }
 0x16a   : > { %v2025_v34 = vpop.eup %2024  ;;  %v679_v35 = vmul.f32 %v2023_v33, %v676_v31  ;;  %vm685_vm5 = vweird.f32 %v2023_v33 }
 0x16b   : > { %v689_v36 = vmul.f32 %v2025_v34, %v677_v32  ;;  %vm695_vm4 = vweird.f32 %v2025_v34  ;;  %vm686_vm8 = vmor %vm684_vm6, %vm685_vm5 }
 0x16c   : > { %v680_v37 = vmul.f32 %v2023_v33, %v679_v35  ;;  %vm696_vm7 = vmor %vm694_vm3, %vm695_vm4 }
 0x16d   : > { %v690_v38 = vmul.f32 %v2025_v34, %v689_v36 }
 0x16e   : > { %v681_v39 = vmul.f32 0.5, %v680_v37 }
 0x16f   : > { %v691_v40 = vmul.f32 0.5, %v690_v38 }
 0x170   : > { %v682_v41 = vsub.f32 1.5, %v681_v39 }
 0x171   : > { %v692_v42 = vsub.f32 1.5, %v691_v40 }
 0x172   : > { %v683_v43 = vmul.f32 %v2023_v33, %v682_v41 }
 0x173   : > { %v693_v44 = vmul.f32 %v2025_v34, %v692_v42 }
 0x174   : > { %v687_v46 = vsel %vm686_vm8, %v2023_v33, %v683_v43 }
 0x175   : > { %v697_v47 = vsel %vm696_vm7, %v2025_v34, %v693_v44  ;;  %v698_v48 = vmul.f32 %v687_v46, %v664_v17 }
 0x176   : > { %v699_v51 = vmul.f32 %v697_v47, %v665_v18 }
 0x177   : > { %v703_v50 = vmul.f32 %v2013_v45, %v698_v48 }
 0x178   : > { %v704_v53 = vmul.f32 %v2013_v45, %v699_v51 }
 0x179   : > { %v708_v52 = vadd.f32 %v2014_v49, %v703_v50 }
 0x17a   : > { %v709_v54 = vadd.f32 %v2014_v49, %v704_v53 }
 0x17b   : > { %1884 = vmatmul.msk.f32.vlgmr.msra.gmra.mxu0 %vm648_vm1, %v708_v52 }
 0x183   : > { %1885 = vmatmul.msk.f32.gmra.mxu0 %vm648_vm1, %v709_v54 }
 0x1f8   : > { %v2571_v55 = vpop.f32.mrf.mxu0 }
 0x1f9   : > { %846 = vrot.lane.b32.xlu0 %v2571_v55, %s2268_s19  ;;  %744 = vrot.lane.b32.xlu1 %v2571_v55, %s2269_s27 }
 0x200   : > { %v2576_v56 = vpop.f32.mrf.mxu0 }
 0x201   : > { %1056 = vrot.lane.b32.xlu0 %v2571_v55, %s2270_s12  ;;  %928 = vrot.lane.b32.xlu1 %v2576_v56, %s2271_s23 }
 0x209   : > { %900 = vrot.lane.b32.xlu1 %v2571_v55, %s2271_s23 }
 0x211   : > { %1054 = vrot.lane.b32.xlu1 %v2571_v55, %s2272_s24 }
 0x219   : > { %1084 = vrot.lane.b32.xlu1 %v2576_v56, %s2270_s12  ;;  %s2828_s12 = scalar_lea.vmem %s2800_s5, %s2501_s11 }
 0x221   : > { %1238 = vrot.lane.b32.xlu1 %v2576_v56, %s2273_s16 }
 0x26b   : > { %v847_v57 = vpop.permute.xlu0 %846  ;;  %v745_v58 = vpop.permute.xlu1 %744 }
 0x26c   : > { %1886 = vmatpush.xpose.msk.msra.mxu1 %vm746_vm9, %v745_v58 }
 0x26f   : > { %1887 = vmatmul.msk.f32.vlgmr.msra.gmra.mxu1 %vm746_vm9, %v2571_v55 }
 0x270   : > { %867 = vmatpush.msrb.mxu1 %v847_v57 }
 0x273   : > { %v929_v59 = vpop.permute.xlu1 %928  ;;  %v1057_v8 = vpop.permute.xlu0 %1056 }
 0x27b   : > { %v901_v60 = vpop.permute.xlu1 %900 }
 0x27c   : > { %1892 = vmatpush.xpose.msk.msra.mxu1 %vm746_vm9, %v901_v60 }
 0x283   : > { %v1055_v63 = vpop.permute.xlu1 %1054 }
 0x28b   : > { %v1085_v0 = vpop.permute.xlu1 %1084 }
 0x28c   : > { %1900 = vmatpush.xpose.msk.msrb.mxu0 %vm746_vm9, %v1085_v0 }
 0x293   : > { %v1239_v35 = vpop.permute.xlu1 %1238 }
 0x2ec   : > { %v768_v61 = vpop.f32.mrf.mxu1 }
 0x2ed   : > { %v798_v62 = vsel %vm746_vm9, %v768_v61, -inf }
 0x2ee   : > { %799 = vmax.xlane.f32.xlu2 %v798_v62 }
 0x306   : > { %772 = vrot.lane.b32.xlu2 %v2576_v56, %s2269_s27 }
 0x30e   : > { %926 = vrot.lane.b32.xlu2 %v2576_v56, %s2274_s13 }
 0x316   : > { %898 = vrot.lane.b32.xlu2 %v2571_v55, %s2274_s13 }
 0x31e   : > { %1210 = vrot.lane.b32.xlu2 %v2571_v55, %s2273_s16 }
 0x326   : > { %1240 = vrot.lane.b32.xlu2 %v2576_v56, %s2275_s17 }
 0x361   : > { %v800_v1 = vpop.xlane.xlu2 %799 }
 0x362   : > { %v804_v4 = vsub.f32 %v768_v61, %v800_v1 }
 0x364   : > { %v806_v5 = vmul.f32 1.442695, %v804_v4 }
 0x366   : > { %2026 = vpow2.f32 %v806_v5 }
 0x369   : > { %v773_v6 = vpop.permute.xlu2 %772 }
 0x36a   : > { %1888 = vmatpush.xpose.msk.msra.mxu2 %vm746_vm9, %v773_v6 }
 0x36c   : > { %v2027_v7 = vpop.eup %2026 }
 0x36d   : > { %1889 = vmatmul.msk.f32.vlgmr.msra.gmra.mxu2 %vm746_vm9, %v2576_v56  ;;  %v810_v9 = vsel %vm746_vm9, %v2027_v7, 0.0 }
 0x36e   : > { %1894 = vmatpush.xpose.msk.msrb.mxu2 %vm746_vm9, %v929_v59  ;;  %811 = vadd.xlane.f32.xlu0 %v810_v9 }
 0x371   : > { %v927_v10 = vpop.permute.xlu2 %926 }
 0x372   : > { %1898 = vmatpush.xpose.msk.msra.mxu2 %vm746_vm9, %v1057_v8 }
 0x375   : > { %1895 = vmatmul.msk.f32.vlgmr.msrb.gmra.mxu2 %vm746_vm9, %v927_v10 }
 0x379   : > { %v899_v11 = vpop.permute.xlu2 %898 }
 0x37d   : > { %1899 = vmatmul.msk.f32.vlgmr.msra.gmra.mxu2 %vm746_vm9, %v1055_v63 }
 0x381   : > { %v1211_v13 = vpop.permute.xlu2 %1210 }
 0x382   : > { %1212 = vrot.lane.b32.xlu0 %v2571_v55, %s2275_s17 }
 0x389   : > { %v1241_v14 = vpop.permute.xlu2 %1240 }
 0x38a   : > { %1082 = vrot.lane.b32.xlu0 %v2576_v56, %s2272_s24  ;;  %1906 = vmatpush.xpose.msk.msra.mxu0 %vm746_vm9, %v1241_v14  ;;  %s2829_s24 = scalar_lea.vmem [#allocation9], %s2485_s14 }
 0x3e1   : > { %v812_v15 = vpop.xlane.xlu0 %811 }
 0x3e2   : > { %2028 = vrcp.f32 %v812_v15  ;;  %v827_v19 = vand.u32 2147483648, %v812_v15  ;;  %v825_v21 = vand.u32 2147483647, %v812_v15  ;;  %vm821_vm11 = vweird.f32 %v812_v15 }
 0x3e4   : > { %v828_v23 = vor.u32 1.1754944e-38, %v827_v19  ;;  %vm826_vm13 = vcmp.eq.f32.partialorder %v825_v21, 8.507059e+37 }
 0x3e8   : > { %v2029_v16 = vpop.eup %2028 }
 0x3e9   : > { %v817_v17 = vmul.f32 %v2029_v16, %v812_v15  ;;  %vm822_vm10 = vweird.f32 %v2029_v16 }
 0x3ea   : > { %vm823_vm12 = vmor %vm821_vm11, %vm822_vm10 }
 0x3eb   : > { %v818_v18 = vsub.f32 1.0, %v817_v17 }
 0x3ed   : > { %v819_v20 = vmul.f32 %v2029_v16, %v818_v18 }
 0x3ef   : > { %v820_v22 = vadd.f32 %v2029_v16, %v819_v20 }
 0x3f0   : > { %v795_v24 = vpop.f32.mrf.mxu2 }
 0x3f1   : > { %v801_v25 = vsel %vm746_vm9, %v795_v24, -inf  ;;  %v824_v26 = vsel %vm823_vm12, %v2029_v16, %v820_v22 }
 0x3f2   : > { %802 = vmax.xlane.f32.xlu0 %v801_v25  ;;  %v829_v27 = vsel %vm826_vm13, %v828_v23, %v824_v26 }
 0x3f3   : > { %v844_v28 = vmul.f32 %v2027_v7, %v829_v27 }
 0x3f4   : > { %v1213_v29 = vpop.permute.xlu0 %1212 }
 0x3f5   : > { %1890 = vmatmul.msk.f32.vlgmr.msrb.gmra.mxu1 %vm746_vm9, %v844_v28  ;;  %1904 = vmatpush.xpose.msk.msrb.mxu2 %vm746_vm9, %v1213_v29 }
 0x3f8   : > { %v951_v30 = vpop.f32.mrf.mxu2  ;;  %1905 = vmatmul.msk.f32.vlgmr.msrb.gmra.mxu2 %vm746_vm9, %v1211_v13 }
 0x3f9   : > { %v957_v31 = vsel %vm746_vm9, %v951_v30, -inf }
 0x3fa   : > { %958 = vmax.xlane.f32.xlu0 %v957_v31 }
 0x3fc   : > { %v1083_v32 = vpop.permute.xlu0 %1082 }
 0x3fd   : > { %1893 = vmatmul.msk.f32.vlgmr.msra.gmra.mxu1 %vm746_vm9, %v899_v11  ;;  %1901 = vmatmul.msk.f32.vlgmr.msrb.gmra.mxu0 %vm746_vm9, %v1083_v32 }
 0x400   : > { %v1079_v33 = vpop.f32.mrf.mxu2 }
 0x401   : > { %v1110_v34 = vsel %vm746_vm9, %v1079_v33, -inf }
 0x402   : > { %1111 = vmax.xlane.f32.xlu1 %v1110_v34 }
 0x405   : > { %1907 = vmatmul.msk.f32.vlgmr.msra.gmra.mxu0 %vm746_vm9, %v1239_v35 }
 0x465   : > { %v803_v36 = vpop.xlane.xlu0 %802 }
 0x466   : > { %v805_v42 = vsub.f32 %v795_v24, %v803_v36 }
 0x468   : > { %v808_v48 = vmul.f32 1.442695, %v805_v42 }
 0x46d   : > { %v959_v37 = vpop.xlane.xlu0 %958 }
 0x46e   : > { %v961_v38 = vsub.f32 %v951_v30, %v959_v37 }
 0x470   : > { %v964_v40 = vmul.f32 1.442695, %v961_v38 }
 0x472   : > { %v2617_v39 = vpop.f32.mrf.mxu1  ;;  %2030 = vpow2.f32 %v964_v40 }
 0x473   : > { %2032 = vpow2.f32 %v808_v48 }
 0x475   : > { %v1112_v41 = vpop.xlane.xlu1 %1111 }
 0x476   : > { %v1116_v45 = vsub.f32 %v1079_v33, %v1112_v41 }
 0x478   : > { %v1118_v49 = vmul.f32 1.442695, %v1116_v45  ;;  %v2621_v50 = vpop.eup %2030 }
 0x479   : > { %v969_v53 = vsel %vm746_vm9, %v2621_v50, 0.0  ;;  %v2627_v58 = vpop.eup %2032 }
 0x47a   : > { %v923_v43 = vpop.f32.mrf.mxu1  ;;  %v1107_v44 = vpop.f32.mrf.mxu0  ;;  %2034 = vpow2.f32 %v1118_v49  ;;  %v813_v60 = vsel %vm746_vm9, %v2627_v58, 0.0 }
 0x47b   : > { %v1113_v46 = vsel %vm746_vm9, %v1107_v44, -inf  ;;  %v954_v47 = vsel %vm746_vm9, %v923_v43, -inf  ;;  %v1235_v51 = vpop.f32.mrf.mxu2 }
 0x47c   : > { %1114 = vmax.xlane.f32.xlu1 %v1113_v46  ;;  %955 = vmax.xlane.f32.xlu2 %v954_v47  ;;  %v1266_v54 = vsel %vm746_vm9, %v1235_v51, -inf }
 0x480   : > { %v2629_v59 = vpop.eup %2034 }
 0x481   : > { %v1122_v61 = vsel %vm746_vm9, %v2629_v59, 0.0 }
 0x482   : > { %v1263_v52 = vpop.f32.mrf.mxu0 }
 0x483   : > { %v1269_v57 = vsel %vm746_vm9, %v1263_v52, -inf }
 0x484   : > { %970 = vadd.xlane.f32.xlu1 %v969_v53  ;;  %1267 = vmax.xlane.f32.xlu2 %v1266_v54 }
 0x485   : > { %1270 = vmax.xlane.f32.xlu0 %v1269_v57 }
 0x48c   : > { %814 = vadd.xlane.f32.xlu2 %v813_v60 }
 0x48d   : > { %1123 = vadd.xlane.f32.xlu0 %v1122_v61 }
 0x49d   : > { %1002 = vrot.lane.b32.xlu1 %v2571_v55, %s2276_s15 }
 0x4a4   : > { %872 = vrot.lane.b32.xlu2 %v2576_v56, %s2268_s19  ;;  %s2281_s19 = smov 24  }
 0x4a5   : > { %1028 = vrot.lane.b32.xlu1 %v2576_v56, %s2276_s15 }
 0x4ef   : > { %v1115_v62 = vpop.xlane.xlu1 %1114  ;;  %v956_v63 = vpop.xlane.xlu2 %955 }
 0x4f0   : > { %v960_v0 = vsub.f32 %v923_v43, %v956_v63  ;;  %v1117_v10 = vsub.f32 %v1107_v44, %v1115_v62 }
 0x4f2   : > { %v962_v1 = vmul.f32 1.442695, %v960_v0  ;;  %v1120_v16 = vmul.f32 1.442695, %v1117_v10 }
 0x4f4   : > { %2036 = vpow2.f32 %v962_v1 }
 0x4f7   : > { %v971_v4 = vpop.xlane.xlu1 %970  ;;  %v1268_v5 = vpop.xlane.xlu2 %1267 }
 0x4f8   : > { %2038 = vrcp.f32 %v971_v4  ;;  %v1271_v6 = vpop.xlane.xlu0 %1270  ;;  %v1272_v8 = vsub.f32 %v1235_v51, %v1268_v5  ;;  %v997_v36 = vand.u32 2147483648, %v971_v4  ;;  %vm991_vm3 = vweird.f32 %v971_v4 }
 0x4f9   : > { %v1273_v7 = vsub.f32 %v1263_v52, %v1271_v6  ;;  %v995_v38 = vand.u32 2147483647, %v971_v4 }
 0x4fa   : > { %v2639_v9 = vpop.eup %2036  ;;  %v1274_v13 = vmul.f32 1.442695, %v1272_v8  ;;  %v998_v45 = vor.u32 1.1754944e-38, %v997_v36 }
 0x4fb   : > { %v1276_v11 = vmul.f32 1.442695, %v1273_v7  ;;  %v966_v14 = vsel %vm746_vm9, %v2639_v9, 0.0  ;;  %vm996_vm6 = vcmp.eq.f32.partialorder %v995_v38, 8.507059e+37 }
 0x4fc   : > { %967 = vadd.xlane.f32.xlu1 %v966_v14 }
 0x4fd   : > { %2040 = vpow2.f32 %v1276_v11 }
 0x4fe   : > { %v2039_v15 = vpop.eup %2038  ;;  %2042 = vpow2.f32 %v1274_v13 }
 0x4ff   : > { %v815_v17 = vpop.xlane.xlu2 %814  ;;  %v987_v18 = vmul.f32 %v2039_v15, %v971_v4  ;;  %vm992_vm15 = vweird.f32 %v2039_v15 }
 0x500   : > { %2044 = vrcp.f32 %v815_v17  ;;  %v841_v30 = vand.u32 2147483648, %v815_v17  ;;  %v839_v32 = vand.u32 2147483647, %v815_v17  ;;  %vm835_vm0 = vweird.f32 %v815_v17  ;;  %vm993_vm5 = vmor %vm991_vm3, %vm992_vm15  ;;  %v1124_v51 = vpop.xlane.xlu0 %1123 }
 0x501   : > { %2046 = vpow2.f32 %v1120_v16  ;;  %v988_v22 = vsub.f32 1.0, %v987_v18  ;;  %v1139_v18 = vand.u32 2147483648, %v1124_v51  ;;  %vm1133_vm13 = vweird.f32 %v1124_v51 }
 0x502   : > { %v842_v37 = vor.u32 1.1754944e-38, %v841_v30  ;;  %vm840_vm4 = vcmp.eq.f32.partialorder %v839_v32, 8.507059e+37 }
 0x503   : > { %v2643_v19 = vpop.eup %2040  ;;  %v989_v28 = vmul.f32 %v2039_v15, %v988_v22  ;;  %v1137_v22 = vand.u32 2147483647, %v1124_v51 }
 0x504   : > { %v2645_v20 = vpop.eup %2042  ;;  %v1281_v21 = vsel %vm746_vm9, %v2643_v19, 0.0 }
 0x505   : > { %1282 = vadd.xlane.f32.xlu2 %v1281_v21  ;;  %v1278_v23 = vsel %vm746_vm9, %v2645_v20, 0.0  ;;  %v990_v34 = vadd.f32 %v2039_v15, %v989_v28 }
 0x506   : > { %v2045_v24 = vpop.eup %2044  ;;  %1279 = vadd.xlane.f32.xlu0 %v1278_v23 }
 0x507   : > { %v831_v25 = vmul.f32 %v2045_v24, %v815_v17  ;;  %v873_v26 = vpop.permute.xlu2 %872  ;;  %v2651_v27 = vpop.eup %2046  ;;  %vm836_vm14 = vweird.f32 %v2045_v24  ;;  %v994_v43 = vsel %vm993_vm5, %v2039_v15, %v990_v34 }
 0x508   : > { %893 = vmatpush.msra.mxu3 %v873_v26  ;;  %v1125_v33 = vsel %vm746_vm9, %v2651_v27, 0.0  ;;  %vm837_vm2 = vmor %vm835_vm0, %vm836_vm14  ;;  %v999_v46 = vsel %vm996_vm6, %v998_v45, %v994_v43 }
 0x509   : > { %v832_v29 = vsub.f32 1.0, %v831_v25  ;;  %v1001_v48 = vmul.f32 %v2621_v50, %v999_v46 }
 0x50b   : > { %v833_v31 = vmul.f32 %v2045_v24, %v832_v29  ;;  %v1140_v29 = vor.u32 1.1754944e-38, %v1139_v18 }
 0x50d   : > { %v834_v35 = vadd.f32 %v2045_v24, %v833_v31 }
 0x50e   : > { %1126 = vadd.xlane.f32.xlu0 %v1125_v33 }
 0x50f   : > { %v1003_v40 = vpop.permute.xlu1 %1002  ;;  %v838_v41 = vsel %vm837_vm2, %v2045_v24, %v834_v35  ;;  %vm1138_vm2 = vcmp.eq.f32.partialorder %v1137_v22, 8.507059e+37 }
 0x510   : > { %1023 = vmatpush.msrb.mxu3 %v1003_v40  ;;  %v843_v42 = vsel %vm840_vm4, %v842_v37, %v838_v41 }
 0x511   : > { %v845_v44 = vmul.f32 %v2627_v58, %v843_v42 }
 0x513   : > { %1891 = vmatmul.msk.f32.vlgmr.msra.gmra.mxu3 %vm746_vm9, %v845_v44 }
 0x515   : > { %1184 = vrot.lane.b32.xlu1 %v2576_v56, %s2277_s21 }
 0x517   : > { %v1029_v47 = vpop.permute.xlu1 %1028 }
 0x518   : > { %1049 = vmatpush.msrb.mxu1 %v1029_v47 }
 0x519   : > { %1897 = vmatmul.msk.f32.vlgmr.msrb.gmra.mxu1 %vm746_vm9, %v1001_v48 }
 0x522   : > { %1158 = vrot.lane.b32.xlu0 %v2571_v55, %s2277_s21 }
 0x52a   : > { %1314 = vrot.lane.b32.xlu0 %v2571_v55, %s2278_s26 }
 0x532   : > { %1340 = vrot.lane.b32.xlu0 %v2576_v56, %s2278_s26 }
 0x56f   : > { %v968_v49 = vpop.xlane.xlu1 %967 }
 0x570   : > { %2048 = vrcp.f32 %v968_v49  ;;  %v983_v58 = vand.u32 2147483648, %v968_v49  ;;  %v981_v61 = vand.u32 2147483647, %v968_v49  ;;  %vm977_vm8 = vweird.f32 %v968_v49 }
 0x571   : > { %2050 = vrcp.f32 %v1124_v51 }
 0x572   : > { %v984_v56 = vor.u32 1.1754944e-38, %v983_v58  ;;  %vm982_vm11 = vcmp.eq.f32.partialorder %v981_v61, 8.507059e+37 }
 0x576   : > { %v2049_v52 = vpop.eup %2048 }
 0x577   : > { %v973_v53 = vmul.f32 %v2049_v52, %v968_v49  ;;  %v2051_v50 = vpop.eup %2050  ;;  %vm978_vm7 = vweird.f32 %v2049_v52 }
 0x578   : > { %v1129_v62 = vmul.f32 %v2051_v50, %v1124_v51  ;;  %vm979_vm10 = vmor %vm977_vm8, %vm978_vm7  ;;  %v2666_v5 = vpop.xlane.xlu2 %1282  ;;  %vm1134_vm12 = vweird.f32 %v2051_v50 }
 0x579   : > { %v2663_v54 = vpop.xlane.xlu0 %1279  ;;  %v974_v57 = vsub.f32 1.0, %v973_v53  ;;  %vm1135_vm14 = vmor %vm1133_vm13, %vm1134_vm12  ;;  %v1307_v48 = vand.u32 2147483647, %v2666_v5 }
 0x57a   : > { %2052 = vrcp.f32 %v2663_v54  ;;  %v1130_v4 = vsub.f32 1.0, %v1129_v62  ;;  %v1295_v37 = vand.u32 2147483648, %v2663_v54  ;;  %vm1289_vm6 = vweird.f32 %v2663_v54 }
 0x57b   : > { %v975_v60 = vmul.f32 %v2049_v52, %v974_v57  ;;  %v1293_v40 = vand.u32 2147483647, %v2663_v54  ;;  %vm1308_vm13 = vcmp.eq.f32.partialorder %v1307_v48, 8.507059e+37 }
 0x57c   : > { %v1131_v8 = vmul.f32 %v2051_v50, %v1130_v4  ;;  %v1296_v45 = vor.u32 1.1754944e-38, %v1295_v37  ;;  %v1496_v37 = vld [vmem:[%s2525_s1 + $0x8] sm:$0xff] }
 0x57d   : > { %v976_v55 = vadd.f32 %v2049_v52, %v975_v60  ;;  %vm1294_vm8 = vcmp.eq.f32.partialorder %v1293_v40, 8.507059e+37 }
 0x57e   : > { %v1132_v15 = vadd.f32 %v2051_v50, %v1131_v8 }
 0x57f   : > { %v980_v63 = vsel %vm979_vm10, %v2049_v52, %v976_v55  ;;  %v1401_v55 = vld [vmem:[%s2516_s28 + $0x18] sm:$0xff] }
 0x580   : > { %v985_v1 = vsel %vm982_vm11, %v984_v56, %v980_v63  ;;  %v2053_v6 = vpop.eup %2052  ;;  %v1136_v25 = vsel %vm1135_vm14, %v2051_v50, %v1132_v15  ;;  %vm1303_vm11 = vweird.f32 %v2666_v5  ;;  %v1400_v56 = vld [vmem:[%s2516_s28 + $0x10] sm:$0xff]  ;;  %1420 = vmatpush.msra.mxu2 %v1401_v55  ;;  %v1399_v63 = vld [vmem:[%s2516_s28 + $0x8] sm:$0xff]  ;;  %vm1392_vm14 = vcmask 130048  }
 0x581   : > { %v1127_v0 = vpop.xlane.xlu0 %1126  ;;  %v1000_v7 = vmul.f32 %v2639_v9, %v985_v1  ;;  %v1285_v10 = vmul.f32 %v2053_v6, %v2663_v54  ;;  %v1141_v32 = vsel %vm1138_vm2, %v1140_v29, %v1136_v25  ;;  %vm1290_vm5 = vweird.f32 %v2053_v6 }
 0x582   : > { %2054 = vrcp.f32 %v1127_v0  ;;  %v1153_v9 = vand.u32 2147483648, %v1127_v0  ;;  %v1151_v24 = vand.u32 2147483647, %v1127_v0  ;;  %vm1147_vm0 = vweird.f32 %v1127_v0  ;;  %vm1291_vm7 = vmor %vm1289_vm6, %vm1290_vm5  ;;  %1421 = vmatpush.msra.mxu2 %v1400_v56 }
 0x583   : > { %2056 = vrcp.f32 %v2666_v5  ;;  %1896 = vmatmul.msk.f32.vlgmr.msrb.gmra.mxu3 %vm746_vm9, %v1000_v7  ;;  %v1286_v16 = vsub.f32 1.0, %v1285_v10  ;;  %v1156_v42 = vmul.f32 %v2629_v59, %v1141_v32 }
 0x584   : > { %v1154_v31 = vor.u32 1.1754944e-38, %v1153_v9  ;;  %vm1152_vm4 = vcmp.eq.f32.partialorder %v1151_v24, 8.507059e+37  ;;  %1422 = vmatpush.msra.mxu2 %v1399_v63 }
 0x585   : > { %v1287_v26 = vmul.f32 %v2053_v6, %v1286_v16 }
 0x587   : > { %v1185_v13 = vpop.permute.xlu1 %1184  ;;  %v1288_v34 = vadd.f32 %v2053_v6, %v1287_v26 }
 0x588   : > { %v2055_v11 = vpop.eup %2054  ;;  %1205 = vmatpush.msra.mxu1 %v1185_v13 }
 0x589   : > { %v1143_v14 = vmul.f32 %v2055_v11, %v1127_v0  ;;  %v2057_v17 = vpop.eup %2056  ;;  %vm1148_vm15 = vweird.f32 %v2055_v11  ;;  %v1292_v43 = vsel %vm1291_vm7, %v2053_v6, %v1288_v34  ;;  %v1398_v0 = vld [vmem:[%s2516_s28] sm:$0xff] }
 0x58a   : > { %v1299_v28 = vmul.f32 %v2057_v17, %v2666_v5  ;;  %vm1149_vm3 = vmor %vm1147_vm0, %vm1148_vm15  ;;  %v1297_v46 = vsel %vm1294_vm8, %v1296_v45, %v1292_v43  ;;  %vm1304_vm10 = vweird.f32 %v2057_v17  ;;  %1423 = vmatpush.msra.mxu2 %v1398_v0  ;;  %vm1395_vm15 = vcmask 195584  }
 0x58b   : > { %v1144_v21 = vsub.f32 1.0, %v1143_v14  ;;  %v1312_v49 = vmul.f32 %v2645_v20, %v1297_v46  ;;  %vm1305_vm12 = vmor %vm1303_vm11, %vm1304_vm10  ;;  %v2282_v0 = vmov 1.4142135  }
 0x58c   : > { %v1300_v35 = vsub.f32 1.0, %v1299_v28 }
 0x58d   : > { %v1145_v23 = vmul.f32 %v2055_v11, %v1144_v21 }
 0x58e   : > { %v1301_v44 = vmul.f32 %v2057_v17, %v1300_v35  ;;  %v1498_v35 = vld [vmem:[%s2525_s1 + $0x18] sm:$0xff] }
 0x58f   : > { %v1146_v30 = vadd.f32 %v2055_v11, %v1145_v23  ;;  %1521 = vmatpush.msrb.mxu0 %v1498_v35  ;;  %v1630_v35 = vld [vmem:[%s2535_s18 + $0x18] sm:$0xff] }
 0x590   : > { %v1302_v47 = vadd.f32 %v2057_v17, %v1301_v44 }
 0x591   : > { %v1150_v33 = vsel %vm1149_vm3, %v2055_v11, %v1146_v30 }
 0x592   : > { %v1155_v36 = vsel %vm1152_vm4, %v1154_v31, %v1150_v33  ;;  %v1306_v51 = vsel %vm1305_vm12, %v2057_v17, %v1302_v47  ;;  %v2015_v17 = vld [vmem:[%s2828_s12] ss:$0 sm:$0xff] }
 0x593   : > { %v1157_v38 = vmul.f32 %v2651_v27, %v1155_v36  ;;  %v1309_v27 = vand.u32 2147483648, %v2666_v5  ;;  %v1497_v36 = vld [vmem:[%s2525_s1 + $0x10] sm:$0xff] }
 0x594   : > { %v1159_v41 = vpop.permute.xlu0 %1158  ;;  %1522 = vmatpush.msrb.mxu0 %v1497_v36 }
 0x595   : > { %1179 = vmatpush.msra.mxu3 %v1159_v41  ;;  %1903 = vmatmul.msk.f32.vlgmr.msra.gmra.mxu1 %vm746_vm9, %v1157_v38  ;;  %v1310_v52 = vor.u32 1.1754944e-38, %v1309_v27  ;;  %v1495_v38 = vld [vmem:[%s2525_s1] sm:$0xff] }
 0x596   : > { %1902 = vmatmul.msk.f32.vlgmr.msra.gmra.mxu3 %vm746_vm9, %v1156_v42  ;;  %v895_v50 = vpop.f32.mrf.mxu3  ;;  %v1051_v20 = vpop.f32.mrf.mxu1  ;;  %1523 = vmatpush.msrb.mxu0 %v1496_v37 }
 0x597   : > { %v1311_v53 = vsel %vm1308_vm13, %v1310_v52, %v1306_v51 }
 0x598   : > { %v1313_v57 = vmul.f32 %v2643_v19, %v1311_v53  ;;  %1524 = vmatpush.msrb.mxu0 %v1495_v38  ;;  %v2016_v53 = vld [vmem:[%s618_s30] ss:$0 sm:$0xff] }
 0x59c   : > { %v1315_v59 = vpop.permute.xlu0 %1314 }
 0x59d   : > { %1335 = vmatpush.msrb.mxu3 %v1315_v59 }
 0x59e   : > { %1908 = vmatmul.msk.f32.vlgmr.msrb.gmra.mxu3 %vm746_vm9, %v1312_v49 }
 0x5a4   : > { %v1341_v54 = vpop.permute.xlu0 %1340 }
 0x5a5   : > { %1361 = vmatpush.msrb.mxu1 %v1341_v54 }
 0x5a6   : > { %1909 = vmatmul.msk.f32.vlgmr.msrb.gmra.mxu1 %vm746_vm9, %v1313_v57 }
 0x606   : > { %v1025_v58 = vpop.f32.mrf.mxu3 }
 0x607   : > { %1368 = vrot.lane.b32.xlu1 %v1025_v58, %s2279_s2 }
 0x612   : > { %v1207_v60 = vpop.f32.mrf.mxu1 }
 0x613   : > { %1378 = vrot.lane.b32.xlu2 %v1207_v60, %s2280_s0 }
 0x619   : > { %v1181_v61 = vpop.f32.mrf.mxu3 }
 0x61a   : > { %1376 = vrot.lane.b32.xlu0 %v1181_v61, %s2280_s0 }
 0x621   : > { %v1337_v62 = vpop.f32.mrf.mxu3 }
 0x622   : > { %1370 = vrot.lane.b32.xlu0 %v1051_v20, %s2279_s2  ;;  %1384 = vrot.lane.b32.xlu1 %v1337_v62, %s2281_s19 }
 0x623   : > { %v1363_v19 = vpop.f32.mrf.mxu1 }
 0x62a   : > { %1386 = vrot.lane.b32.xlu1 %v1363_v19, %s2281_s19 }
 0x66d   : > { %v1379_v13 = vpop.permute.xlu2 %1378 }
 0x679   : > { %v1369_v1 = vpop.permute.xlu1 %1368 }
 0x67a   : > { %v1390_v5 = vsel %vm746_vm9, %v2617_v39, %v1369_v1 }
 0x68c   : > { %v1377_v4 = vpop.permute.xlu0 %1376 }
 0x68d   : > { %v1393_v6 = vsel %vm1392_vm14, %v1390_v5, %v1377_v4 }
 0x694   : > { %v1385_v7 = vpop.permute.xlu1 %1384  ;;  %v1371_v10 = vpop.permute.xlu0 %1370 }
 0x695   : > { %v1396_v8 = vsel %vm1395_vm15, %v1393_v6, %v1385_v7  ;;  %v1391_v11 = vsel %vm746_vm9, %v895_v50, %v1371_v10  ;;  %v2017_v50 = vld [vmem:[%s2829_s24] ss:$0 sm:$0xff] }
 0x696   : > { %1910 = vmatmul.msk.f32.vlgmr.msra.gmra.mxu2 %vm648_vm1, %v1396_v8  ;;  %v1394_v15 = vsel %vm1392_vm14, %v1391_v11, %v1379_v13  ;;  %v2018_v8 = vld [vmem:[%s626_s25] ss:$0 sm:$0xff]  ;;  %vm1635_vm14 = vcmask 523264  }
 0x69c   : > { %v1387_v14 = vpop.permute.xlu1 %1386 }
 0x69d   : > { %v1397_v16 = vsel %vm1395_vm15, %v1394_v15, %v1387_v14 }
 0x69e   : > { %1911 = vmatmul.msk.f32.gmra.mxu2 %vm648_vm1, %v1397_v16 }
 0x719   : > { %v1425_v39 = vpop.f32.mrf.mxu2 }
 0x71a   : > { %v1431_v18 = vadd.f32 %v1425_v39, %v2543_v2  ;;  %v1634_v39 = vld [vmem:[%s2535_s18 + $0x38] sm:$0xff] }
 0x71b   : > { %1650 = vmatpush.msra.mxu3 %v1634_v39 }
 0x71c   : > { %v2704_v21 = vadd.f32 %v2015_v17, %v1431_v18 }
 0x71e   : > { %v1441_v22 = vsel %vm648_vm1, %v2704_v21, 0.0 }
 0x71f   : > { %1442 = vadd.xlane.f32.xlu0 %v1441_v22 }
 0x721   : > { %v1428_v9 = vpop.f32.mrf.mxu2 }
 0x722   : > { %v1432_v23 = vadd.f32 %v1428_v9, %v2545_v3 }
 0x724   : > { %v2709_v24 = vadd.f32 %v2015_v17, %v1432_v23  ;;  %v1633_v23 = vld [vmem:[%s2535_s18 + $0x30] sm:$0xff] }
 0x725   : > { %1651 = vmatpush.msra.mxu3 %v1633_v23 }
 0x726   : > { %v1444_v25 = vsel %vm648_vm1, %v2709_v24, 0.0 }
 0x727   : > { %1445 = vadd.xlane.f32.xlu1 %v1444_v25 }
 0x792   : > { %v1443_v26 = vpop.xlane.xlu0 %1442 }
 0x793   : > { %v1447_v2 = vmul.f32 %v1443_v26, %v2551_v12 }
 0x795   : > { %v1449_v28 = vsub.f32 %v2704_v21, %v1447_v2 }
 0x797   : > { %v1451_v29 = vmul.f32 %v1449_v28, %v1449_v28 }
 0x799   : > { %v1453_v30 = vsel %vm648_vm1, %v1451_v29, 0.0 }
 0x79a   : > { %1454 = vadd.xlane.f32.xlu2 %v1453_v30  ;;  %v1446_v3 = vpop.xlane.xlu1 %1445 }
 0x79b   : > { %v1448_v31 = vmul.f32 %v1446_v3, %v2551_v12 }
 0x79d   : > { %v1450_v32 = vsub.f32 %v2709_v24, %v1448_v31  ;;  %v1631_v31 = vld [vmem:[%s2535_s18 + $0x20] sm:$0xff] }
 0x79f   : > { %v1452_v33 = vmul.f32 %v1450_v32, %v1450_v32 }
 0x7a1   : > { %v1456_v34 = vsel %vm648_vm1, %v1452_v33, 0.0 }
 0x7a2   : > { %1457 = vadd.xlane.f32.xlu0 %v1456_v34 }
 0x80d   : > { %v1455_v40 = vpop.xlane.xlu2 %1454 }
 0x80e   : > { %v1459_v41 = vmul.f32 %v1455_v40, %v2551_v12  ;;  %v1629_v40 = vld [vmem:[%s2535_s18 + $0x10] sm:$0xff] }
 0x810   : > { %v1461_v42 = vadd.f32 1e-05, %v1459_v41 }
 0x812   : > { %2058 = vrsqrt.f32 %v1461_v42  ;;  %vm1469_vm0 = vweird.f32 %v1461_v42 }
 0x815   : > { %v1458_v43 = vpop.xlane.xlu0 %1457 }
 0x816   : > { %v1460_v44 = vmul.f32 %v1458_v43, %v2551_v12 }
 0x818   : > { %v2059_v45 = vpop.eup %2058  ;;  %v1462_v46 = vadd.f32 1e-05, %v1460_v44 }
 0x819   : > { %v1464_v47 = vmul.f32 %v2059_v45, %v1461_v42  ;;  %vm1470_vm9 = vweird.f32 %v2059_v45 }
 0x81a   : > { %2060 = vrsqrt.f32 %v1462_v46  ;;  %vm1471_vm2 = vmor %vm1469_vm0, %vm1470_vm9  ;;  %vm1479_vm4 = vweird.f32 %v1462_v46 }
 0x81b   : > { %v1465_v27 = vmul.f32 %v2059_v45, %v1464_v47  ;;  %2062 = vrcp.f32 %v2282_v0 }
 0x81d   : > { %v1466_v48 = vmul.f32 0.5, %v1465_v27 }
 0x81f   : > { %v1467_v59 = vsub.f32 1.5, %v1466_v48  ;;  %v1627_v48 = vld [vmem:[%s2535_s18] sm:$0xff] }
 0x820   : > { %v2061_v49 = vpop.eup %2060 }
 0x821   : > { %v1468_v51 = vmul.f32 %v2059_v45, %v1467_v59  ;;  %v1474_v52 = vmul.f32 %v2061_v49, %v1462_v46  ;;  %vm1480_vm3 = vweird.f32 %v2061_v49  ;;  %v2063_v1 = vpop.eup %2062 }
 0x822   : > { %vm1481_vm5 = vmor %vm1479_vm4, %vm1480_vm3  ;;  %v1535_v4 = vmul.f32 1.4142135, %v2063_v1  ;;  %vm1539_vm6 = vweird.f32 %v2063_v1 }
 0x823   : > { %v1472_v12 = vsel %vm1471_vm2, %v2059_v45, %v1468_v51  ;;  %v1475_v54 = vmul.f32 %v2061_v49, %v1474_v52  ;;  %v1628_v45 = vld [vmem:[%s2535_s18 + $0x8] sm:$0xff] }
 0x824   : > { %v1483_v57 = vmul.f32 %v1472_v12, %v1449_v28  ;;  %v1536_v5 = vsub.f32 1.0, %v1535_v4  ;;  %v1632_v28 = vld [vmem:[%s2535_s18 + $0x28] sm:$0xff] }
 0x825   : > { %v1476_v58 = vmul.f32 0.5, %v1475_v54  ;;  %1652 = vmatpush.msra.mxu3 %v1632_v28 }
 0x826   : > { %v1488_v20 = vmul.f32 %v2016_v53, %v1483_v57  ;;  %v1537_v6 = vmul.f32 %v2063_v1, %v1536_v5 }
 0x827   : > { %v1477_v60 = vsub.f32 1.5, %v1476_v58  ;;  %1653 = vmatpush.msra.mxu3 %v1631_v31 }
 0x828   : > { %v1493_v61 = vadd.f32 %v2017_v50, %v1488_v20  ;;  %v1538_v7 = vadd.f32 %v2063_v1, %v1537_v6 }
 0x829   : > { %v1478_v62 = vmul.f32 %v2061_v49, %v1477_v60  ;;  %1654 = vmatpush.msra.mxu3 %v1630_v35 }
 0x82a   : > { %1912 = vmatmul.msk.f32.vlgmr.msrb.gmra.mxu0 %vm648_vm1, %v1493_v61  ;;  %v1540_v11 = vsel %vm1539_vm6, %v2063_v1, %v1538_v7 }
 0x82b   : > { %v1482_v19 = vsel %vm1481_vm5, %v2061_v49, %v1478_v62  ;;  %1655 = vmatpush.msra.mxu3 %v1629_v40 }
 0x82c   : > { %v1484_v55 = vmul.f32 %v1482_v19, %v1450_v32 }
 0x82d   : > { %1656 = vmatpush.msra.mxu3 %v1628_v45 }
 0x82e   : > { %v1489_v56 = vmul.f32 %v2016_v53, %v1484_v55 }
 0x82f   : > { %1657 = vmatpush.msra.mxu3 %v1627_v48 }
 0x830   : > { %v1494_v63 = vadd.f32 %v2017_v50, %v1489_v56 }
 0x832   : > { %1913 = vmatmul.msk.f32.gmra.mxu0 %vm648_vm1, %v1494_v63 }
 0x8a7   : > { %v1526_v10 = vpop.f32.mrf.mxu0 }
 0x8a8   : > { %v2739_v13 = vadd.f32 %v2018_v8, %v1526_v10 }
 0x8aa   : > { %v2742_v14 = vmul.f32 %v1540_v11, %v2739_v13 }
 0x8ac   : > { %v1543_v15 = vmul.f32 %v2742_v14, %v2742_v14 }
 0x8ae   : > { %v1544_v16 = vmin.f32 %v1543_v15, 16.0 }
 0x8af   : > { %v1529_v17 = vpop.f32.mrf.mxu0 }
 0x8b0   : > { %v1545_v18 = vmul.f32 2.1237322e-06, %v1544_v16  ;;  %v1556_v22 = vmul.f32 3.8918573e-05, %v1544_v16  ;;  %v2747_v9 = vadd.f32 %v2018_v8, %v1529_v17 }
 0x8b2   : > { %v1546_v25 = vadd.f32 0.00028619796, %v1545_v18  ;;  %v1557_v26 = vadd.f32 0.001143296, %v1556_v22  ;;  %v2751_v2 = vmul.f32 %v1540_v11, %v2747_v9 }
 0x8b4   : > { %v1547_v29 = vmul.f32 %v1546_v25, %v1544_v16  ;;  %v1558_v30 = vmul.f32 %v1557_v26, %v1544_v16  ;;  %v1583_v3 = vmul.f32 %v2751_v2, %v2751_v2 }
 0x8b6   : > { %v1559_v32 = vadd.f32 0.014752088, %v1558_v30  ;;  %v1584_v33 = vmin.f32 %v1583_v3, 16.0  ;;  %v1548_v34 = vadd.f32 0.0036580483, %v1547_v29 }
 0x8b8   : > { %v1560_v36 = vmul.f32 %v1559_v32, %v1544_v16  ;;  %v1585_v37 = vmul.f32 2.1237322e-06, %v1584_v33  ;;  %v1596_v38 = vmul.f32 3.8918573e-05, %v1584_v33  ;;  %v1549_v43 = vmul.f32 %v1548_v34, %v1544_v16 }
 0x8b9   : > { %v1532_v32 = vmul.f32 0.5, %v2739_v13 }
 0x8ba   : > { %v1561_v41 = vadd.f32 0.112945676, %v1560_v36  ;;  %v1586_v42 = vadd.f32 0.00028619796, %v1585_v37  ;;  %v1597_v44 = vadd.f32 0.001143296, %v1596_v38 }
 0x8bb   : > { %v1550_v49 = vadd.f32 0.05243302, %v1549_v43 }
 0x8bc   : > { %v1562_v46 = vmul.f32 %v1561_v41, %v1544_v16  ;;  %v1587_v47 = vmul.f32 %v1586_v42, %v1584_v33  ;;  %v1598_v27 = vmul.f32 %v1597_v44, %v1584_v33  ;;  %v1533_v42 = vmul.f32 0.5, %v2747_v9  ;;  %v2019_v44 = vld [vmem:[%s634_s29] ss:$0 sm:$0xff] }
 0x8bd   : > { %v1551_v57 = vmul.f32 %v1550_v49, %v1544_v16 }
 0x8be   : > { %v1563_v59 = vadd.f32 0.4994258, %v1562_v46  ;;  %v1599_v51 = vadd.f32 0.014752088, %v1598_v27  ;;  %v1588_v53 = vadd.f32 0.0036580483, %v1587_v47 }
 0x8bf   : > { %v1552_v60 = vadd.f32 0.18741608, %v1551_v57 }
 0x8c0   : > { %v1564_v52 = vmul.f32 %v1563_v59, %v1544_v16  ;;  %v1600_v12 = vmul.f32 %v1599_v51, %v1584_v33  ;;  %v1589_v58 = vmul.f32 %v1588_v53, %v1584_v33 }
 0x8c1   : > { %v1553_v56 = vmul.f32 %v1552_v60, %v1544_v16 }
 0x8c2   : > { %v1565_v54 = vadd.f32 1.0, %v1564_v52  ;;  %v1601_v50 = vadd.f32 0.112945676, %v1600_v12  ;;  %v1590_v62 = vadd.f32 0.05243302, %v1589_v58 }
 0x8c3   : > { %v1554_v6 = vadd.f32 1.1283791, %v1553_v56 }
 0x8c4   : > { %2064 = vrcp.f32 %v1565_v54  ;;  %v1602_v20 = vmul.f32 %v1601_v50, %v1584_v33  ;;  %v1591_v1 = vmul.f32 %v1590_v62, %v1584_v33  ;;  %v1577_v5 = vand.u32 2147483648, %v1565_v54 }
 0x8c5   : > { %v1575_v8 = vand.u32 2147483647, %v1565_v54  ;;  %vm1571_vm8 = vweird.f32 %v1565_v54  ;;  %v1555_v39 = vmul.f32 %v1554_v6, %v2742_v14 }
 0x8c6   : > { %v1603_v61 = vadd.f32 0.4994258, %v1602_v20  ;;  %v1592_v10 = vadd.f32 0.18741608, %v1591_v1  ;;  %v1578_v15 = vor.u32 1.1754944e-38, %v1577_v5 }
 0x8c7   : > { %vm1576_vm11 = vcmp.eq.f32.partialorder %v1575_v8, 8.507059e+37 }
 0x8c8   : > { %v1604_v19 = vmul.f32 %v1603_v61, %v1584_v33  ;;  %v1593_v22 = vmul.f32 %v1592_v10, %v1584_v33 }
 0x8ca   : > { %v2065_v55 = vpop.eup %2064  ;;  %v1605_v0 = vadd.f32 1.0, %v1604_v19  ;;  %v1594_v30 = vadd.f32 1.1283791, %v1593_v22 }
 0x8cb   : > { %v1567_v63 = vmul.f32 %v2065_v55, %v1565_v54  ;;  %vm1572_vm7 = vweird.f32 %v2065_v55 }
 0x8cc   : > { %2066 = vrcp.f32 %v1605_v0  ;;  %vm1573_vm10 = vmor %vm1571_vm8, %vm1572_vm7  ;;  %v1617_v29 = vand.u32 2147483648, %v1605_v0  ;;  %v1615_v31 = vand.u32 2147483647, %v1605_v0  ;;  %vm1611_vm13 = vweird.f32 %v1605_v0 }
 0x8cd   : > { %v1568_v4 = vsub.f32 1.0, %v1567_v63  ;;  %v1595_v33 = vmul.f32 %v1594_v30, %v2751_v2 }
 0x8ce   : > { %v1618_v36 = vor.u32 1.1754944e-38, %v1617_v29  ;;  %vm1616_vm9 = vcmp.eq.f32.partialorder %v1615_v31, 8.507059e+37 }
 0x8cf   : > { %v1569_v7 = vmul.f32 %v2065_v55, %v1568_v4 }
 0x8d1   : > { %v1570_v11 = vadd.f32 %v2065_v55, %v1569_v7 }
 0x8d2   : > { %v2067_v17 = vpop.eup %2066 }
 0x8d3   : > { %v1574_v18 = vsel %vm1573_vm10, %v2065_v55, %v1570_v11  ;;  %v1607_v23 = vmul.f32 %v2067_v17, %v1605_v0  ;;  %vm1612_vm12 = vweird.f32 %v2067_v17 }
 0x8d4   : > { %v1579_v16 = vsel %vm1576_vm11, %v1578_v15, %v1574_v18  ;;  %vm1613_vm15 = vmor %vm1611_vm13, %vm1612_vm12 }
 0x8d5   : > { %v1580_v25 = vmul.f32 %v1579_v16, %v1555_v39  ;;  %v1608_v26 = vsub.f32 1.0, %v1607_v23 }
 0x8d7   : > { %v1914_v28 = vclamps-f32 %v1580_v25, 1.0  ;;  %v1609_v3 = vmul.f32 %v2067_v17, %v1608_v26 }
 0x8d9   : > { %v1623_v34 = vadd.f32 1.0, %v1914_v28  ;;  %v1610_v35 = vadd.f32 %v2067_v17, %v1609_v3 }
 0x8db   : > { %v1625_v14 = vmul.f32 %v1623_v34, %v1532_v32  ;;  %v1614_v37 = vsel %vm1613_vm15, %v2067_v17, %v1610_v35 }
 0x8dc   : > { %v1619_v38 = vsel %vm1616_vm9, %v1618_v36, %v1614_v37 }
 0x8dd   : > { %1916 = vmatmul.msk.f32.vlgmr.msra.gmra.mxu3 %vm1635_vm14, %v1625_v14  ;;  %v1620_v40 = vmul.f32 %v1619_v38, %v1595_v33 }
 0x8df   : > { %v1915_v41 = vclamps-f32 %v1620_v40, 1.0 }
 0x8e1   : > { %v1624_v43 = vadd.f32 1.0, %v1915_v41 }
 0x8e3   : > { %v1626_v13 = vmul.f32 %v1624_v43, %v1533_v42 }
 0x8e5   : > { %1917 = vmatmul.msk.f32.gmra.mxu3 %vm1635_vm14, %v1626_v13 }
 0x960   : > { %v1659_v45 = vpop.f32.mrf.mxu3 }
 0x961   : > { %v1665_v46 = vadd.f32 %v1659_v45, %v2704_v21 }
 0x963   : > { %v1671_v2 = vadd.f32 %v2019_v44, %v1665_v46 }
 0x965   : > { %1673 = vst.msk [vmem:[#allocation2] sm:$0xff] %vm648_vm1, %v1671_v2 }
 0x968   : > { %v1662_v47 = vpop.f32.mrf.mxu3 }
 0x969   : > { %v1666_v27 = vadd.f32 %v1662_v47, %v2709_v24  ;;  %1678 = sbr.rel (%p1918_p8) target bundleno = 2416 (0x970), region = 92 }
 0x96b   : > { %v1672_v48 = vadd.f32 %v2019_v44, %v1666_v27 }
 0x96d   : > { %1674 = vst.msk [vmem:[#allocation2 + $0x8] sm:$0xff] %vm648_vm1, %v1672_v48 }
 0x96e   : > { %1679 = vst.msk [vmem:[#allocation11] sm:$0xff] %vm648_vm1, %v1671_v2 }
 0x96f   : > { %1680 = vst.msk [vmem:[#allocation11 + $0x8] sm:$0xff] %vm648_vm1, %v1672_v48 }
 0x970 PF: > { %p1958_p10 = scmp.eq.s32.totalorder %s2399_s20, 1  ;;  %s2283_s11 = smov [#allocation11]  }
 0x971   : > { %s1686_s29 = sshll.u32 %s2283_s11, 4  ;;  %s2831_s15 = sld [smem:[#allocation23_spill]]  ;;  %s1687_s29 = int_to_ptr.vmem [resolvable:$true] %s1686_s29 }
 0x972   : > { %s2284_s26 = smov 128  }
 0x977   : > { %s1688_s21 = sshll.u32 %s2831_s15, 4  ;;  %s1689_s21 = int_to_ptr.hbm [resolvable:$true] %s1688_s21 }
 0x978   : > { %1938 = dma.vmem_to_hbm [thread:$0]  (%p1958_p10), %s1687_s29, 256, %s1689_s21, [#allocation5], %s2284_s26, %s2284_s26, %s2279_s2  }
 0x979   : > { %2245 = dma.done.wait (%p1958_p10), [#allocation5], 256  }
 0x97a   : > { %2247 = vsyncadd (%p1958_p10), [#allocation5], 4294967040 }
 0x97b PF: > { %s2832_s24 = sld [smem:[#allocation17_spill]]  ;;  %s2835_s21 = smov %s2254_s22 }
 0x97c   : > { %s2833_s0 = sld [smem:[#allocation16_spill]] }
 0x97d   : > { %s2834_s23 = sld [smem:[#allocation18_spill]] }
 0x981   : > { %p27_p4 = scmp.ge.s32.totalorder %s2832_s24, 4  }
 0x982   : > { %s2836_s22 = smov %s2833_s0 }
 0x983   :  { %29 = sbr.rel (!%p27_p4) target bundleno = 13 (0xd), region = 166 }
 0x988   :  { %1705 = vsyncpa [#allocation4], 1 }
 0x989   :  { %1707 = vsyncpa [#allocation4 + $0x1], 1 }
 0x98a   :  { %1708 = vsyncpa [#allocation7], 1 }
 0x98b   :  { %1710 = vsyncpa [#allocation7 + $0x1], 1 }
 0x98c   :  { %1711 = vsyncpa [#allocation10], 1 }
 0x98d   :  { %1713 = vsyncpa [#allocation10 + $0x1], 1 }
 0x98e   :  { %1714 = vsyncpa [#allocation5], 1 }
 0x98f   :  { %1716 = vsyncpa [#allocation5 + $0x1], 1 }

</bundles_post_ra>
